<compile_context>
chip_gen: v7x
topology: tpu7x:2x2x1
jax: 0.10.0
libtpu: 0.0.40
codegen_flags: <defaults>
</compile_context>

<pallas_src>
import math

import jax
import jax.numpy as jnp
from jax.experimental import pallas as pl
from jax.experimental.pallas import tpu as pltpu


# ----------------------------------------------------------------------------
# Fused kernel: one grid step = (one batch element, one encoder layer)
# ----------------------------------------------------------------------------

def make_kernel(num_heads, mm_dtype):
    approx_recip = (mm_dtype != jnp.float32)

    def kernel(x_ref, pe_ref,
               wqkv_ref, bqkv_ref, wo_ref, bo_ref,
               g1_ref, be1_ref, w1_ref, b1_ref, w2_ref, b2_ref,
               g2_ref, be2_ref, wl_ref, bl_ref,
               o_ref, y_ref):
        S, E = y_ref.shape
        H = num_heads
        Dh = E // H
        l = pl.program_id(1)
        c = lambda t: t.astype(mm_dtype)       # MXU-operand cast (no-op on f32 path)

        # ---- first layer step: positional encoding (dropout == identity, eval) ----
        @pl.when(l == 0)
        def _init():
            y_ref[...] = x_ref[...] + pe_ref[...]

        y = y_ref[...]                          # [S, E] f32 activation carried in VMEM

        # ---- self-attention --------------------------------------------------
        # single lane-dense QKV matmul; 1/sqrt(Dh) already folded into Wq/bq.
        qkv = jnp.dot(c(y), wqkv_ref[...],
                      preferred_element_type=jnp.float32) + bqkv_ref[...]   # [S, 3E]

        def split_heads(base):                  # -> [H, S, Dh] via static lane slices
            return jnp.stack(
                [qkv[:, base + h * Dh: base + (h + 1) * Dh] for h in range(H)], axis=0)

        qh = split_heads(0)
        kh = split_heads(E)
        vh = split_heads(2 * E)

        # scores per head (heads batched), causal mask built in-kernel in f32
        s = jnp.einsum('hqd,hkd->hqk', c(qh), c(kh),
                       preferred_element_type=jnp.float32)                  # [H, S, S]
        rows = jax.lax.broadcasted_iota(jnp.int32, (S, S), 0)
        cols = jax.lax.broadcasted_iota(jnp.int32, (S, S), 1)
        s = s + jnp.where(cols <= rows, 0.0, -jnp.inf)                      # causal

        s = s - jnp.max(s, axis=-1, keepdims=True)
        p = jnp.exp(s)
        p = p * pl.reciprocal(jnp.sum(p, axis=-1, keepdims=True), approx=approx_recip)

        ctx = jnp.einsum('hqk,hkd->hqd', c(p), c(vh),
                         preferred_element_type=jnp.float32)                # [H, S, Dh]
        ctx = jnp.concatenate([ctx[h] for h in range(H)], axis=-1)          # [S, E]
        attn = jnp.dot(c(ctx), wo_ref[...],
                       preferred_element_type=jnp.float32) + bo_ref[...]    # [S, E]

        # ---- residual + LayerNorm 1 (post-norm, eps=1e-5) — f32 ----------------
        y = y + attn
        mu = jnp.mean(y, axis=-1, keepdims=True)
        var = jnp.mean((y - mu) ** 2, axis=-1, keepdims=True)
        y = (y - mu) * jax.lax.rsqrt(var + 1e-5) * g1_ref[...] + be1_ref[...]

        # ---- feed-forward: linear1 -> ReLU -> linear2 --------------------------
        h1 = jnp.dot(c(y), w1_ref[...], preferred_element_type=jnp.float32) + b1_ref[...]
        h1 = jnp.maximum(h1, 0.0)
        ff = jnp.dot(c(h1), w2_ref[...], preferred_element_type=jnp.float32) + b2_ref[...]

        # ---- residual + LayerNorm 2 — f32 --------------------------------------
        z = y + ff
        mu2 = jnp.mean(z, axis=-1, keepdims=True)
        var2 = jnp.mean((z - mu2) ** 2, axis=-1, keepdims=True)
        y = (z - mu2) * jax.lax.rsqrt(var2 + 1e-5) * g2_ref[...] + be2_ref[...]

        y_ref[...] = y

        # ---- after last layer: final Linear(E, 1) as VPU multiply + lane reduce ----
        @pl.when(l == pl.num_programs(1) - 1)
        def _final():
            o_ref[...] = jnp.sum(y * wl_ref[...], axis=-1, keepdims=True) + bl_ref[...]

    return kernel


# ----------------------------------------------------------------------------
# Wrapper: grid=(B, L), per-layer weight streaming, activation carry in VMEM
# ----------------------------------------------------------------------------

def make_forward(num_heads, mm_dtype=jnp.bfloat16):
    kernel = make_kernel(num_heads, mm_dtype)

    @jax.jit
    def forward(x, pe, params, wl, bl):
        B, S, E = x.shape
        L = params["wqkv"].shape[0]
        Hff = params["w1"].shape[-1]
        Dh = E // num_heads

        def layer_spec(arr):
            # stream layer l's slice; leading (layer) dim squeezed out of the kernel ref
            return pl.BlockSpec((None,) + tuple(arr.shape[1:]), lambda b, l: (l, 0, 0))

        in_specs = [
            pl.BlockSpec((None, S, E), lambda b, l: (b, 0, 0)),   # x (per batch element)
            pl.BlockSpec((S, E), lambda b, l: (0, 0)),            # positional encoding
            layer_spec(params["wqkv"]), layer_spec(params["bqkv"]),
            layer_spec(params["wo"]), layer_spec(params["bo"]),
            layer_spec(params["g1"]), layer_spec(params["be1"]),
            layer_spec(params["w1"]), layer_spec(params["b1"]),
            layer_spec(params["w2"]), layer_spec(params["b2"]),
            layer_spec(params["g2"]), layer_spec(params["be2"]),
            pl.BlockSpec((1, E), lambda b, l: (0, 0)),            # final linear weight (row)
            pl.BlockSpec((1, 1), lambda b, l: (0, 0)),            # final linear bias
        ]
        out_spec = pl.BlockSpec((None, S, 1), lambda b, l: (b, 0, 0))

        # --- VMEM budget for one layer's working set (double-buffered) + headroom ---
        w_itemsize = params["wqkv"].dtype.itemsize
        per_layer_w_bytes = ((E * 3 * E + E * E + 2 * E * Hff) * w_itemsize
                             + (9 * E + Hff) * 4)
        act_bytes = 4 * (S * (16 * E + 2 * Hff) + 4 * num_heads * S * S)
        vmem_limit = int(min(64 << 20, 4 * (2 * per_layer_w_bytes + act_bytes) + (4 << 20)))

        flops_layer = (2 * S * E * 3 * E + 4 * num_heads * S * S * Dh
                       + 2 * S * E * E + 4 * S * E * Hff)
        cost = pl.CostEstimate(
            flops=int(B * (L * flops_layer + 2 * S * E)),
            transcendentals=int(B * L * (num_heads * S * S + 2 * S)),
            bytes_accessed=int(B * S * E * 4 + B * S * 4 + S * E * 4
                               + B * sum(int(v.size) * v.dtype.itemsize
                                         for v in params.values())),
        )

        grid_spec = pltpu.PrefetchScalarGridSpec(
            num_scalar_prefetch=0,
            grid=(B, L),                        # batch (parallel) x layer (carried)
            in_specs=in_specs,
            out_specs=out_spec,
            scratch_shapes=[pltpu.VMEM((S, E), jnp.float32)],   # activation carry
        )

        return pl.pallas_call(
            kernel,
            out_shape=jax.ShapeDtypeStruct((B, S, 1), jnp.float32),
            grid_spec=grid_spec,
            compiler_params=pltpu.CompilerParams(
                dimension_semantics=("parallel", "arbitrary"),
                vmem_limit_bytes=vmem_limit),
            cost_estimate=cost,
        )(x, pe,
          params["wqkv"], params["bqkv"], params["wo"], params["bo"],
          params["g1"], params["be1"], params["w1"], params["b1"],
          params["w2"], params["b2"], params["g2"], params["be2"],
          wl.reshape(1, E), bl.reshape(1, 1))

    return forward


# ----------------------------------------------------------------------------
# Host-side one-time parameter packing (hoisted out of the forward hot path)
# ----------------------------------------------------------------------------

def pack_params(layers, num_heads, mm_dtype=jnp.bfloat16):
    """Stack per-layer params; fuse Wq|Wk|Wv; fold 1/sqrt(Dh) into Wq/bq; cast
    matmul weights to the MXU operand dtype (biases / LN params stay f32)."""
    E = layers[0]["wq"].shape[0]
    Hff = layers[0]["w1"].shape[1]
    scale = 1.0 / math.sqrt(E // num_heads)

    def stack(f, dtype):
        return jnp.stack([f(p) for p in layers], axis=0).astype(dtype)

    return dict(
        wqkv=stack(lambda p: jnp.concatenate(
            [p["wq"] * scale, p["wk"], p["wv"]], axis=1), mm_dtype),          # [L, E, 3E]
        bqkv=stack(lambda p: jnp.concatenate(
            [p["bq"] * scale, p["bk"], p["bv"]]).reshape(1, 3 * E), jnp.float32),
        wo=stack(lambda p: p["wo"], mm_dtype),                                 # [L, E, E]
        bo=stack(lambda p: p["bo"].reshape(1, E), jnp.float32),
        g1=stack(lambda p: p["g1"].reshape(1, E), jnp.float32),
        be1=stack(lambda p: p["be1"].reshape(1, E), jnp.float32),
        w1=stack(lambda p: p["w1"], mm_dtype),                                 # [L, E, Hff]
        b1=stack(lambda p: p["b1"].reshape(1, Hff), jnp.float32),
        w2=stack(lambda p: p["w2"], mm_dtype),                                 # [L, Hff, E]
        b2=stack(lambda p: p["b2"].reshape(1, E), jnp.float32),
        g2=stack(lambda p: p["g2"].reshape(1, E), jnp.float32),
        be2=stack(lambda p: p["be2"].reshape(1, E), jnp.float32),
    )


# ----------------------------------------------------------------------------
# Buffers / parameters (deterministic, in-script)
# ----------------------------------------------------------------------------

def make_positional_encoding(seq_len, d_model):
    position = jnp.arange(seq_len, dtype=jnp.float32)[:, None]
    div_term = jnp.exp(jnp.arange(0, d_model, 2, dtype=jnp.float32)
                       * (-math.log(10000.0) / d_model))
    pe = jnp.zeros((seq_len, d_model), jnp.float32)
    pe = pe.at[:, 0::2].set(jnp.sin(position * div_term))
    pe = pe.at[:, 1::2].set(jnp.cos(position * div_term))
    return pe


def make_causal_mask(seq_len):
    i = jnp.arange(seq_len)
    return jnp.where(i[None, :] > i[:, None], -jnp.inf, 0.0).astype(jnp.float32)


def init_layer_params(key, E, Hff, num_layers):
    params = []
    for l in range(num_layers):
        ks = jax.random.split(jax.random.fold_in(key, l), 12)
        u = lambda k, shape: jax.random.uniform(k, shape, jnp.float32, -0.1, 0.1)
        params.append(dict(
            wq=u(ks[0], (E, E)), bq=u(ks[1], (E,)),
            wk=u(ks[2], (E, E)), bk=u(ks[3], (E,)),
            wv=u(ks[4], (E, E)), bv=u(ks[5], (E,)),
            wo=u(ks[6], (E, E)), bo=u(ks[7], (E,)),
            w1=u(ks[8], (E, Hff)), b1=u(ks[9], (Hff,)),
            w2=u(ks[10], (Hff, E)), b2=u(ks[11], (E,)),
            g1=jnp.ones((E,), jnp.float32), be1=jnp.zeros((E,), jnp.float32),
            g2=jnp.ones((E,), jnp.float32), be2=jnp.zeros((E,), jnp.float32),
        ))
    return params


# ----------------------------------------------------------------------------
# Pure-JAX reference (PyTorch eval-mode semantics) for validation
# ----------------------------------------------------------------------------

def _ln(x, g, b):
    mu = x.mean(-1, keepdims=True)
    var = ((x - mu) ** 2).mean(-1, keepdims=True)
    return (x - mu) / jnp.sqrt(var + 1e-5) * g + b


def ref_forward(x, pe, mask, layers, wl, bl, num_heads):
    B, S, E = x.shape
    Dh = E // num_heads
    y = x + pe[None]
    for p in layers:
        q = y @ p["wq"] + p["bq"]
        k = y @ p["wk"] + p["bk"]
        v = y @ p["wv"] + p["bv"]
        split = lambda t: t.reshape(B, S, num_heads, Dh).transpose(0, 2, 1, 3)
        qh, kh, vh = split(q), split(k), split(v)
        s = jnp.einsum("bhqd,bhkd->bhqk", qh, kh) / math.sqrt(Dh) + mask
        pr = jax.nn.softmax(s, axis=-1)
        o = jnp.einsum("bhqk,bhkd->bhqd", pr, vh).transpose(0, 2, 1, 3).reshape(B, S, E)
        o = o @ p["wo"] + p["bo"]
        y = _ln(y + o, p["g1"], p["be1"])
        ff = jnp.maximum(y @ p["w1"] + p["b1"], 0.0) @ p["w2"] + p["b2"]
        y = _ln(y + ff, p["g2"], p["be2"])
    return y @ wl + bl


# ----------------------------------------------------------------------------

if __name__ == "__main__":
    # batch=2, seq=8, embedding_dim=32, 4 heads, ffn hidden=64, 2 layers
    B, S, E, H, Hff, L = 2, 8, 32, 4, 64, 2

    key = jax.random.PRNGKey(0)
    kx, kp, kl = jax.random.split(key, 3)

    x = jax.random.normal(kx, (B, S, E), jnp.float32)            # [batch, seq, emb]
    layers = init_layer_params(kp, E, Hff, L)
    wl = jax.random.uniform(kl, (E, 1), jnp.float32, -0.1, 0.1)  # final Linear(E,1) weight
    bl = jnp.zeros((1,), jnp.float32)                            # bias zeroed (init_weights)

    pe = make_positional_encoding(S, E)
    mask = make_causal_mask(S)                                   # [S, S] for the reference

    ref = ref_forward(x, pe, mask, layers, wl, bl, H)

    # --- production path: bf16 MXU operands, f32 accumulation -----------------
    packed_bf16 = pack_params(layers, H, jnp.bfloat16)           # packed once (hoisted)
    fwd_bf16 = make_forward(H, jnp.bfloat16)
    out_bf16 = jax.block_until_ready(fwd_bf16(x, pe, packed_bf16, wl, bl))
    assert out_bf16.shape == (B, S, 1)
    assert jnp.allclose(out_bf16, ref, rtol=2e-2, atol=2e-2), \
        float(jnp.max(jnp.abs(out_bf16 - ref)))

    # --- strict validation path: identical kernel structure, f32 operands -----
    packed_f32 = pack_params(layers, H, jnp.float32)
    fwd_f32 = make_forward(H, jnp.float32)
    out_f32 = jax.block_until_ready(fwd_f32(x, pe, packed_f32, wl, bl))
    assert out_f32.shape == (B, S, 1)
    assert jnp.allclose(out_f32, ref, rtol=1e-3, atol=1e-3), \
        float(jnp.max(jnp.abs(out_f32 - ref)))

    print("KERNEL_OK")
</pallas_src>

<mosaic_0001>
module attributes {stable_mosaic.version = 11 : i64} {
  func.func @kernel(%arg0: i32, %arg1: i32, %arg2: memref<1x8x32xf32, #tpu.memory_space<vmem>>, %arg3: memref<8x32xf32, #tpu.memory_space<vmem>>, %arg4: memref<1x32x96xbf16, #tpu.memory_space<vmem>>, %arg5: memref<1x1x96xf32, #tpu.memory_space<vmem>>, %arg6: memref<1x32x32xbf16, #tpu.memory_space<vmem>>, %arg7: memref<1x1x32xf32, #tpu.memory_space<vmem>>, %arg8: memref<1x1x32xf32, #tpu.memory_space<vmem>>, %arg9: memref<1x1x32xf32, #tpu.memory_space<vmem>>, %arg10: memref<1x32x64xbf16, #tpu.memory_space<vmem>>, %arg11: memref<1x1x64xf32, #tpu.memory_space<vmem>>, %arg12: memref<1x64x32xbf16, #tpu.memory_space<vmem>>, %arg13: memref<1x1x32xf32, #tpu.memory_space<vmem>>, %arg14: memref<1x1x32xf32, #tpu.memory_space<vmem>>, %arg15: memref<1x1x32xf32, #tpu.memory_space<vmem>>, %arg16: memref<1x32xf32, #tpu.memory_space<vmem>>, %arg17: memref<1x1xf32, #tpu.memory_space<vmem>>, %arg18: memref<1x8x1xf32, #tpu.memory_space<vmem>>, %arg19: memref<8x32xf32, #tpu.memory_space<vmem>>) attributes {dimension_semantics = [#tpu.dimension_semantics<parallel>, #tpu.dimension_semantics<arbitrary>], iteration_bounds = array<i64: 2, 2>, scalar_prefetch = 0 : i64, scratch_operands = 1 : i64, tpu.core_type = #tpu.core_type<tc>, window_params = [{transform_indices = @transform_0, window_bounds = array<i64: 1, 8, 32>}, {pipeline_mode = #tpu.pipeline_mode<synchronous>, transform_indices = @transform_1, window_bounds = array<i64: 8, 32>}, {transform_indices = @transform_2, window_bounds = array<i64: 1, 32, 96>}, {transform_indices = @transform_3, window_bounds = array<i64: 1, 1, 96>}, {transform_indices = @transform_4, window_bounds = array<i64: 1, 32, 32>}, {transform_indices = @transform_5, window_bounds = array<i64: 1, 1, 32>}, {transform_indices = @transform_6, window_bounds = array<i64: 1, 1, 32>}, {transform_indices = @transform_7, window_bounds = array<i64: 1, 1, 32>}, {transform_indices = @transform_8, window_bounds = array<i64: 1, 32, 64>}, {transform_indices = @transform_9, window_bounds = array<i64: 1, 1, 64>}, {transform_indices = @transform_10, window_bounds = array<i64: 1, 64, 32>}, {transform_indices = @transform_11, window_bounds = array<i64: 1, 1, 32>}, {transform_indices = @transform_12, window_bounds = array<i64: 1, 1, 32>}, {transform_indices = @transform_13, window_bounds = array<i64: 1, 1, 32>}, {pipeline_mode = #tpu.pipeline_mode<synchronous>, transform_indices = @transform_14, window_bounds = array<i64: 1, 32>}, {pipeline_mode = #tpu.pipeline_mode<synchronous>, transform_indices = @transform_15, window_bounds = array<i64: 1, 1>}, {transform_indices = @transform_16, window_bounds = array<i64: 1, 8, 1>}]} {
    %c0_i32 = arith.constant 0 : i32
    %0 = arith.cmpi eq, %arg1, %c0_i32 : i32
    %1 = arith.extui %0 : i1 to i32
    %c0_i32_0 = arith.constant 0 : i32
    %2 = arith.cmpi ne, %1, %c0_i32_0 : i32
    scf.if %2 {
      %c0_61 = arith.constant 0 : index
      %c0_62 = arith.constant 0 : index
      %c0_63 = arith.constant 0 : index
      %157 = vector.load %arg2[%c0_61, %c0_62, %c0_63] : memref<1x8x32xf32, #tpu.memory_space<vmem>>, vector<1x8x32xf32>
      %158 = vector.shape_cast %157 : vector<1x8x32xf32> to vector<8x32xf32>
      %c0_64 = arith.constant 0 : index
      %c0_65 = arith.constant 0 : index
      %159 = vector.load %arg3[%c0_64, %c0_65] : memref<8x32xf32, #tpu.memory_space<vmem>>, vector<8x32xf32>
      %160 = arith.addf %158, %159 : vector<8x32xf32>
      %c0_66 = arith.constant 0 : index
      %c0_67 = arith.constant 0 : index
      %161 = vector.load %arg19[%c0_66, %c0_67] : memref<8x32xf32, #tpu.memory_space<vmem>>, vector<8x32xf32>
      tpu.vector_store %arg19[%c0_66, %c0_67], %160 {strides = array<i32>} : memref<8x32xf32, #tpu.memory_space<vmem>>, vector<8x32xf32>,
    } else {
    }
    %c0 = arith.constant 0 : index
    %c0_1 = arith.constant 0 : index
    %3 = vector.load %arg19[%c0, %c0_1] : memref<8x32xf32, #tpu.memory_space<vmem>>, vector<8x32xf32>
    %4 = arith.truncf %3 : vector<8x32xf32> to vector<8x32xbf16>
    %c0_2 = arith.constant 0 : index
    %c0_3 = arith.constant 0 : index
    %c0_4 = arith.constant 0 : index
    %5 = vector.load %arg4[%c0_2, %c0_3, %c0_4] : memref<1x32x96xbf16, #tpu.memory_space<vmem>>, vector<1x32x96xbf16>
    %6 = vector.shape_cast %5 : vector<1x32x96xbf16> to vector<32x96xbf16>
    %cst = arith.constant dense<0.000000e+00> : vector<8x96xf32>
    %7 = tpu.matmul %4, %6, %cst {dimension_numbers = #tpu.dot_dimension_numbers<[1], [0], [0], [1], [0, 0, 1, 1], [], []>} : vector<8x32xbf16>, vector<32x96xbf16>, vector<8x96xf32> -> vector<8x96xf32>
    %c0_5 = arith.constant 0 : index
    %c0_6 = arith.constant 0 : index
    %c0_7 = arith.constant 0 : index
    %8 = vector.load %arg5[%c0_5, %c0_6, %c0_7] : memref<1x1x96xf32, #tpu.memory_space<vmem>>, vector<1x1x96xf32>
    %9 = vector.shape_cast %8 : vector<1x1x96xf32> to vector<1x96xf32>
    %10 = vector.broadcast %9 : vector<1x96xf32> to vector<8x96xf32>
    %11 = arith.addf %7, %10 : vector<8x96xf32>
    %12 = vector.extract_strided_slice %11 {offsets = [0, 0], sizes = [8, 8], strides = [1, 1]} : vector<8x96xf32> to vector<8x8xf32>
    %13 = vector.extract_strided_slice %11 {offsets = [0, 8], sizes = [8, 8], strides = [1, 1]} : vector<8x96xf32> to vector<8x8xf32>
    %14 = vector.extract_strided_slice %11 {offsets = [0, 16], sizes = [8, 8], strides = [1, 1]} : vector<8x96xf32> to vector<8x8xf32>
    %15 = vector.extract_strided_slice %11 {offsets = [0, 24], sizes = [8, 8], strides = [1, 1]} : vector<8x96xf32> to vector<8x8xf32>
    %16 = vector.shape_cast %12 : vector<8x8xf32> to vector<1x8x8xf32>
    %17 = vector.shape_cast %13 : vector<8x8xf32> to vector<1x8x8xf32>
    %18 = vector.shape_cast %14 : vector<8x8xf32> to vector<1x8x8xf32>
    %19 = vector.shape_cast %15 : vector<8x8xf32> to vector<1x8x8xf32>
    %20 = tpu.concatenate %16, %17, %18, %19 in 0 : vector<1x8x8xf32>, vector<1x8x8xf32>, vector<1x8x8xf32>, vector<1x8x8xf32> -> vector<4x8x8xf32>
    %21 = vector.extract_strided_slice %11 {offsets = [0, 32], sizes = [8, 8], strides = [1, 1]} : vector<8x96xf32> to vector<8x8xf32>
    %22 = vector.extract_strided_slice %11 {offsets = [0, 40], sizes = [8, 8], strides = [1, 1]} : vector<8x96xf32> to vector<8x8xf32>
    %23 = vector.extract_strided_slice %11 {offsets = [0, 48], sizes = [8, 8], strides = [1, 1]} : vector<8x96xf32> to vector<8x8xf32>
    %24 = vector.extract_strided_slice %11 {offsets = [0, 56], sizes = [8, 8], strides = [1, 1]} : vector<8x96xf32> to vector<8x8xf32>
    %25 = vector.shape_cast %21 : vector<8x8xf32> to vector<1x8x8xf32>
    %26 = vector.shape_cast %22 : vector<8x8xf32> to vector<1x8x8xf32>
    %27 = vector.shape_cast %23 : vector<8x8xf32> to vector<1x8x8xf32>
    %28 = vector.shape_cast %24 : vector<8x8xf32> to vector<1x8x8xf32>
    %29 = tpu.concatenate %25, %26, %27, %28 in 0 : vector<1x8x8xf32>, vector<1x8x8xf32>, vector<1x8x8xf32>, vector<1x8x8xf32> -> vector<4x8x8xf32>
    %30 = vector.extract_strided_slice %11 {offsets = [0, 64], sizes = [8, 8], strides = [1, 1]} : vector<8x96xf32> to vector<8x8xf32>
    %31 = vector.extract_strided_slice %11 {offsets = [0, 72], sizes = [8, 8], strides = [1, 1]} : vector<8x96xf32> to vector<8x8xf32>
    %32 = vector.extract_strided_slice %11 {offsets = [0, 80], sizes = [8, 8], strides = [1, 1]} : vector<8x96xf32> to vector<8x8xf32>
    %33 = vector.extract_strided_slice %11 {offsets = [0, 88], sizes = [8, 8], strides = [1, 1]} : vector<8x96xf32> to vector<8x8xf32>
    %34 = vector.shape_cast %30 : vector<8x8xf32> to vector<1x8x8xf32>
    %35 = vector.shape_cast %31 : vector<8x8xf32> to vector<1x8x8xf32>
    %36 = vector.shape_cast %32 : vector<8x8xf32> to vector<1x8x8xf32>
    %37 = vector.shape_cast %33 : vector<8x8xf32> to vector<1x8x8xf32>
    %38 = tpu.concatenate %34, %35, %36, %37 in 0 : vector<1x8x8xf32>, vector<1x8x8xf32>, vector<1x8x8xf32>, vector<1x8x8xf32> -> vector<4x8x8xf32>
    %39 = arith.truncf %20 : vector<4x8x8xf32> to vector<4x8x8xbf16>
    %40 = arith.truncf %29 : vector<4x8x8xf32> to vector<4x8x8xbf16>
    "tpu.trace_start"() <{level = 10 : i32, message = "hqd,hkd->hqk"}> : () -> ()
    %cst_8 = arith.constant dense<0.000000e+00> : vector<4x8x8xf32>
    %41 = tpu.matmul %39, %40, %cst_8 {dimension_numbers = #tpu.dot_dimension_numbers<[2], [2], [1], [1], [0, 0, 0, 1, 1, 1], [0], [0]>} : vector<4x8x8xbf16>, vector<4x8x8xbf16>, vector<4x8x8xf32> -> vector<4x8x8xf32>
    "tpu.trace_stop"() : () -> ()
    %42 = tpu.iota {dimensions = array<i32: 0>} : vector<8x8xi32>
    %43 = tpu.iota {dimensions = array<i32: 1>} : vector<8x8xi32>
    %44 = arith.cmpi sle, %43, %42 : vector<8x8xi32>
    %cst_9 = arith.constant 0.000000e+00 : f32
    %cst_10 = arith.constant 0xFF800000 : f32
    %45 = vector.broadcast %cst_9 : f32 to vector<8x8xf32>
    %46 = vector.broadcast %cst_10 : f32 to vector<8x8xf32>
    %47 = arith.select %44, %45, %46 : vector<8x8xi1>, vector<8x8xf32>
    %48 = vector.shape_cast %47 : vector<8x8xf32> to vector<1x8x8xf32>
    %49 = vector.broadcast %48 : vector<1x8x8xf32> to vector<4x8x8xf32>
    %50 = arith.addf %41, %49 : vector<4x8x8xf32>
    %cst_11 = arith.constant dense<0xFF800000> : vector<4x8xf32>
    %51 = vector.multi_reduction <maximumf>, %50, %cst_11 [2] : vector<4x8x8xf32> to vector<4x8xf32>
    %52 = vector.shape_cast %51 : vector<4x8xf32> to vector<4x8x1xf32>
    %53 = vector.broadcast %52 : vector<4x8x1xf32> to vector<4x8x8xf32>
    %54 = arith.subf %50, %53 : vector<4x8x8xf32>
    %55 = math.exp %54 : vector<4x8x8xf32>
    %cst_12 = arith.constant dense<0.000000e+00> : vector<4x8xf32>
    %56 = vector.multi_reduction <add>, %55, %cst_12 [2] : vector<4x8x8xf32> to vector<4x8xf32>
    %57 = vector.shape_cast %56 : vector<4x8xf32> to vector<4x8x1xf32>
    %58 = tpu.reciprocal %57 {approx = true} : vector<4x8x1xf32> -> vector<4x8x1xf32>
    %59 = vector.broadcast %58 : vector<4x8x1xf32> to vector<4x8x8xf32>
    %60 = arith.mulf %55, %59 : vector<4x8x8xf32>
    %61 = arith.truncf %60 : vector<4x8x8xf32> to vector<4x8x8xbf16>
    %62 = arith.truncf %38 : vector<4x8x8xf32> to vector<4x8x8xbf16>
    "tpu.trace_start"() <{level = 10 : i32, message = "hqk,hkd->hqd"}> : () -> ()
    %cst_13 = arith.constant dense<0.000000e+00> : vector<4x8x8xf32>
    %63 = tpu.matmul %61, %62, %cst_13 {dimension_numbers = #tpu.dot_dimension_numbers<[2], [1], [1], [2], [0, 0, 0, 1, 1, 2], [0], [0]>} : vector<4x8x8xbf16>, vector<4x8x8xbf16>, vector<4x8x8xf32> -> vector<4x8x8xf32>
    "tpu.trace_stop"() : () -> ()
    %64 = vector.extract_strided_slice %63 {offsets = [0, 0, 0], sizes = [1, 8, 8], strides = [1, 1, 1]} : vector<4x8x8xf32> to vector<1x8x8xf32>
    %65 = vector.shape_cast %64 : vector<1x8x8xf32> to vector<8x8xf32>
    %66 = vector.extract_strided_slice %63 {offsets = [1, 0, 0], sizes = [1, 8, 8], strides = [1, 1, 1]} : vector<4x8x8xf32> to vector<1x8x8xf32>
    %67 = vector.shape_cast %66 : vector<1x8x8xf32> to vector<8x8xf32>
    %68 = vector.extract_strided_slice %63 {offsets = [2, 0, 0], sizes = [1, 8, 8], strides = [1, 1, 1]} : vector<4x8x8xf32> to vector<1x8x8xf32>
    %69 = vector.shape_cast %68 : vector<1x8x8xf32> to vector<8x8xf32>
    %70 = vector.extract_strided_slice %63 {offsets = [3, 0, 0], sizes = [1, 8, 8], strides = [1, 1, 1]} : vector<4x8x8xf32> to vector<1x8x8xf32>
    %71 = vector.shape_cast %70 : vector<1x8x8xf32> to vector<8x8xf32>
    %72 = tpu.concatenate %65, %67, %69, %71 in 1 : vector<8x8xf32>, vector<8x8xf32>, vector<8x8xf32>, vector<8x8xf32> -> vector<8x32xf32>
    %73 = arith.truncf %72 : vector<8x32xf32> to vector<8x32xbf16>
    %c0_14 = arith.constant 0 : index
    %c0_15 = arith.constant 0 : index
    %c0_16 = arith.constant 0 : index
    %74 = vector.load %arg6[%c0_14, %c0_15, %c0_16] : memref<1x32x32xbf16, #tpu.memory_space<vmem>>, vector<1x32x32xbf16>
    %75 = vector.shape_cast %74 : vector<1x32x32xbf16> to vector<32x32xbf16>
    %cst_17 = arith.constant dense<0.000000e+00> : vector<8x32xf32>
    %76 = tpu.matmul %73, %75, %cst_17 {dimension_numbers = #tpu.dot_dimension_numbers<[1], [0], [0], [1], [0, 0, 1, 1], [], []>} : vector<8x32xbf16>, vector<32x32xbf16>, vector<8x32xf32> -> vector<8x32xf32>
    %c0_18 = arith.constant 0 : index
    %c0_19 = arith.constant 0 : index
    %c0_20 = arith.constant 0 : index
    %77 = vector.load %arg7[%c0_18, %c0_19, %c0_20] : memref<1x1x32xf32, #tpu.memory_space<vmem>>, vector<1x1x32xf32>
    %78 = vector.shape_cast %77 : vector<1x1x32xf32> to vector<1x32xf32>
    %79 = vector.broadcast %78 : vector<1x32xf32> to vector<8x32xf32>
    %80 = arith.addf %76, %79 : vector<8x32xf32>
    %81 = arith.addf %3, %80 : vector<8x32xf32>
    %cst_21 = arith.constant dense<0.000000e+00> : vector<8xf32>
    %82 = vector.multi_reduction <add>, %81, %cst_21 [1] : vector<8x32xf32> to vector<8xf32>
    %83 = vector.shape_cast %82 : vector<8xf32> to vector<8x1xf32>
    %cst_22 = arith.constant 3.200000e+01 : f32
    %84 = vector.broadcast %cst_22 : f32 to vector<8x1xf32>
    %85 = arith.divf %83, %84 : vector<8x1xf32>
    %86 = vector.broadcast %85 : vector<8x1xf32> to vector<8x32xf32>
    %87 = arith.subf %81, %86 : vector<8x32xf32>
    %88 = arith.mulf %87, %87 : vector<8x32xf32>
    %cst_23 = arith.constant dense<0.000000e+00> : vector<8xf32>
    %89 = vector.multi_reduction <add>, %88, %cst_23 [1] : vector<8x32xf32> to vector<8xf32>
    %90 = vector.shape_cast %89 : vector<8xf32> to vector<8x1xf32>
    %cst_24 = arith.constant 3.200000e+01 : f32
    %91 = vector.broadcast %cst_24 : f32 to vector<8x1xf32>
    %92 = arith.divf %90, %91 : vector<8x1xf32>
    %93 = vector.broadcast %85 : vector<8x1xf32> to vector<8x32xf32>
    %94 = arith.subf %81, %93 : vector<8x32xf32>
    %cst_25 = arith.constant 9.99999974E-6 : f32
    %95 = vector.broadcast %cst_25 : f32 to vector<8x1xf32>
    %96 = arith.addf %92, %95 : vector<8x1xf32>
    %97 = math.rsqrt %96 : vector<8x1xf32>
    %98 = vector.broadcast %97 : vector<8x1xf32> to vector<8x32xf32>
    %99 = arith.mulf %94, %98 : vector<8x32xf32>
    %c0_26 = arith.constant 0 : index
    %c0_27 = arith.constant 0 : index
    %c0_28 = arith.constant 0 : index
    %100 = vector.load %arg8[%c0_26, %c0_27, %c0_28] : memref<1x1x32xf32, #tpu.memory_space<vmem>>, vector<1x1x32xf32>
    %101 = vector.shape_cast %100 : vector<1x1x32xf32> to vector<1x32xf32>
    %102 = vector.broadcast %101 : vector<1x32xf32> to vector<8x32xf32>
    %103 = arith.mulf %99, %102 : vector<8x32xf32>
    %c0_29 = arith.constant 0 : index
    %c0_30 = arith.constant 0 : index
    %c0_31 = arith.constant 0 : index
    %104 = vector.load %arg9[%c0_29, %c0_30, %c0_31] : memref<1x1x32xf32, #tpu.memory_space<vmem>>, vector<1x1x32xf32>
    %105 = vector.shape_cast %104 : vector<1x1x32xf32> to vector<1x32xf32>
    %106 = vector.broadcast %105 : vector<1x32xf32> to vector<8x32xf32>
    %107 = arith.addf %103, %106 : vector<8x32xf32>
    %108 = arith.truncf %107 : vector<8x32xf32> to vector<8x32xbf16>
    %c0_32 = arith.constant 0 : index
    %c0_33 = arith.constant 0 : index
    %c0_34 = arith.constant 0 : index
    %109 = vector.load %arg10[%c0_32, %c0_33, %c0_34] : memref<1x32x64xbf16, #tpu.memory_space<vmem>>, vector<1x32x64xbf16>
    %110 = vector.shape_cast %109 : vector<1x32x64xbf16> to vector<32x64xbf16>
    %cst_35 = arith.constant dense<0.000000e+00> : vector<8x64xf32>
    %111 = tpu.matmul %108, %110, %cst_35 {dimension_numbers = #tpu.dot_dimension_numbers<[1], [0], [0], [1], [0, 0, 1, 1], [], []>} : vector<8x32xbf16>, vector<32x64xbf16>, vector<8x64xf32> -> vector<8x64xf32>
    %c0_36 = arith.constant 0 : index
    %c0_37 = arith.constant 0 : index
    %c0_38 = arith.constant 0 : index
    %112 = vector.load %arg11[%c0_36, %c0_37, %c0_38] : memref<1x1x64xf32, #tpu.memory_space<vmem>>, vector<1x1x64xf32>
    %113 = vector.shape_cast %112 : vector<1x1x64xf32> to vector<1x64xf32>
    %114 = vector.broadcast %113 : vector<1x64xf32> to vector<8x64xf32>
    %115 = arith.addf %111, %114 : vector<8x64xf32>
    %cst_39 = arith.constant 0.000000e+00 : f32
    %116 = vector.broadcast %cst_39 : f32 to vector<8x64xf32>
    %117 = arith.maximumf %115, %116 : vector<8x64xf32>
    %118 = arith.truncf %117 : vector<8x64xf32> to vector<8x64xbf16>
    %c0_40 = arith.constant 0 : index
    %c0_41 = arith.constant 0 : index
    %c0_42 = arith.constant 0 : index
    %119 = vector.load %arg12[%c0_40, %c0_41, %c0_42] : memref<1x64x32xbf16, #tpu.memory_space<vmem>>, vector<1x64x32xbf16>
    %120 = vector.shape_cast %119 : vector<1x64x32xbf16> to vector<64x32xbf16>
    %cst_43 = arith.constant dense<0.000000e+00> : vector<8x32xf32>
    %121 = tpu.matmul %118, %120, %cst_43 {dimension_numbers = #tpu.dot_dimension_numbers<[1], [0], [0], [1], [0, 0, 1, 1], [], []>} : vector<8x64xbf16>, vector<64x32xbf16>, vector<8x32xf32> -> vector<8x32xf32>
    %c0_44 = arith.constant 0 : index
    %c0_45 = arith.constant 0 : index
    %c0_46 = arith.constant 0 : index
    %122 = vector.load %arg13[%c0_44, %c0_45, %c0_46] : memref<1x1x32xf32, #tpu.memory_space<vmem>>, vector<1x1x32xf32>
    %123 = vector.shape_cast %122 : vector<1x1x32xf32> to vector<1x32xf32>
    %124 = vector.broadcast %123 : vector<1x32xf32> to vector<8x32xf32>
    %125 = arith.addf %121, %124 : vector<8x32xf32>
    %126 = arith.addf %107, %125 : vector<8x32xf32>
    %cst_47 = arith.constant dense<0.000000e+00> : vector<8xf32>
    %127 = vector.multi_reduction <add>, %126, %cst_47 [1] : vector<8x32xf32> to vector<8xf32>
    %128 = vector.shape_cast %127 : vector<8xf32> to vector<8x1xf32>
    %cst_48 = arith.constant 3.200000e+01 : f32
    %129 = vector.broadcast %cst_48 : f32 to vector<8x1xf32>
    %130 = arith.divf %128, %129 : vector<8x1xf32>
    %131 = vector.broadcast %130 : vector<8x1xf32> to vector<8x32xf32>
    %132 = arith.subf %126, %131 : vector<8x32xf32>
    %133 = arith.mulf %132, %132 : vector<8x32xf32>
    %cst_49 = arith.constant dense<0.000000e+00> : vector<8xf32>
    %134 = vector.multi_reduction <add>, %133, %cst_49 [1] : vector<8x32xf32> to vector<8xf32>
    %135 = vector.shape_cast %134 : vector<8xf32> to vector<8x1xf32>
    %cst_50 = arith.constant 3.200000e+01 : f32
    %136 = vector.broadcast %cst_50 : f32 to vector<8x1xf32>
    %137 = arith.divf %135, %136 : vector<8x1xf32>
    %138 = vector.broadcast %130 : vector<8x1xf32> to vector<8x32xf32>
    %139 = arith.subf %126, %138 : vector<8x32xf32>
    %cst_51 = arith.constant 9.99999974E-6 : f32
    %140 = vector.broadcast %cst_51 : f32 to vector<8x1xf32>
    %141 = arith.addf %137, %140 : vector<8x1xf32>
    %142 = math.rsqrt %141 : vector<8x1xf32>
    %143 = vector.broadcast %142 : vector<8x1xf32> to vector<8x32xf32>
    %144 = arith.mulf %139, %143 : vector<8x32xf32>
    %c0_52 = arith.constant 0 : index
    %c0_53 = arith.constant 0 : index
    %c0_54 = arith.constant 0 : index
    %145 = vector.load %arg14[%c0_52, %c0_53, %c0_54] : memref<1x1x32xf32, #tpu.memory_space<vmem>>, vector<1x1x32xf32>
    %146 = vector.shape_cast %145 : vector<1x1x32xf32> to vector<1x32xf32>
    %147 = vector.broadcast %146 : vector<1x32xf32> to vector<8x32xf32>
    %148 = arith.mulf %144, %147 : vector<8x32xf32>
    %c0_55 = arith.constant 0 : index
    %c0_56 = arith.constant 0 : index
    %c0_57 = arith.constant 0 : index
    %149 = vector.load %arg15[%c0_55, %c0_56, %c0_57] : memref<1x1x32xf32, #tpu.memory_space<vmem>>, vector<1x1x32xf32>
    %150 = vector.shape_cast %149 : vector<1x1x32xf32> to vector<1x32xf32>
    %151 = vector.broadcast %150 : vector<1x32xf32> to vector<8x32xf32>
    %152 = arith.addf %148, %151 : vector<8x32xf32>
    %c0_58 = arith.constant 0 : index
    %c0_59 = arith.constant 0 : index
    %153 = vector.load %arg19[%c0_58, %c0_59] : memref<8x32xf32, #tpu.memory_space<vmem>>, vector<8x32xf32>
    tpu.vector_store %arg19[%c0_58, %c0_59], %152 {strides = array<i32>} : memref<8x32xf32, #tpu.memory_space<vmem>>, vector<8x32xf32>,
    %c1_i32 = arith.constant 1 : i32
    %154 = arith.cmpi eq, %arg1, %c1_i32 : i32
    %155 = arith.extui %154 : i1 to i32
    %c0_i32_60 = arith.constant 0 : i32
    %156 = arith.cmpi ne, %155, %c0_i32_60 : i32
    scf.if %156 {
      %c0_61 = arith.constant 0 : index
      %c0_62 = arith.constant 0 : index
      %157 = vector.load %arg16[%c0_61, %c0_62] : memref<1x32xf32, #tpu.memory_space<vmem>>, vector<1x32xf32>
      %158 = vector.broadcast %157 : vector<1x32xf32> to vector<8x32xf32>
      %159 = arith.mulf %152, %158 : vector<8x32xf32>
      %cst_63 = arith.constant dense<0.000000e+00> : vector<8xf32>
      %160 = vector.multi_reduction <add>, %159, %cst_63 [1] : vector<8x32xf32> to vector<8xf32>
      %161 = vector.shape_cast %160 : vector<8xf32> to vector<8x1xf32>
      %c0_64 = arith.constant 0 : index
      %c0_65 = arith.constant 0 : index
      %162 = vector.load %arg17[%c0_64, %c0_65] : memref<1x1xf32, #tpu.memory_space<vmem>>, vector<1x1xf32>
      %163 = vector.broadcast %162 : vector<1x1xf32> to vector<8x1xf32>
      %164 = arith.addf %161, %163 : vector<8x1xf32>
      %c0_66 = arith.constant 0 : index
      %c0_67 = arith.constant 0 : index
      %c0_68 = arith.constant 0 : index
      %165 = vector.load %arg18[%c0_66, %c0_67, %c0_68] : memref<1x8x1xf32, #tpu.memory_space<vmem>>, vector<1x8x1xf32>
      %166 = vector.shape_cast %165 : vector<1x8x1xf32> to vector<8x1xf32>
      %167 = vector.shape_cast %164 : vector<8x1xf32> to vector<1x8x1xf32>
      tpu.vector_store %arg18[%c0_66, %c0_67, %c0_68], %167 {strides = array<i32>} : memref<1x8x1xf32, #tpu.memory_space<vmem>>, vector<1x8x1xf32>,
    } else {
    }
    return
  }
  func.func @transform_0(%arg0: i32, %arg1: i32) -> (i32, i32, i32) {
    %c0_i32 = arith.constant 0 : i32
    %c0_i32_0 = arith.constant 0 : i32
    %c0_i32_1 = arith.constant 0 : i32
    return %arg0, %c0_i32, %c0_i32_0 : i32, i32, i32
  }
  func.func @transform_1(%arg0: i32, %arg1: i32) -> (i32, i32) {
    %c0_i32 = arith.constant 0 : i32
    %c0_i32_0 = arith.constant 0 : i32
    %c0_i32_1 = arith.constant 0 : i32
    return %c0_i32, %c0_i32_0 : i32, i32
  }
  func.func @transform_2(%arg0: i32, %arg1: i32) -> (i32, i32, i32) {
    %c0_i32 = arith.constant 0 : i32
    %c0_i32_0 = arith.constant 0 : i32
    %c0_i32_1 = arith.constant 0 : i32
    return %arg1, %c0_i32, %c0_i32_0 : i32, i32, i32
  }
  func.func @transform_3(%arg0: i32, %arg1: i32) -> (i32, i32, i32) {
    %c0_i32 = arith.constant 0 : i32
    %c0_i32_0 = arith.constant 0 : i32
    %c0_i32_1 = arith.constant 0 : i32
    return %arg1, %c0_i32, %c0_i32_0 : i32, i32, i32
  }
  func.func @transform_4(%arg0: i32, %arg1: i32) -> (i32, i32, i32) {
    %c0_i32 = arith.constant 0 : i32
    %c0_i32_0 = arith.constant 0 : i32
    %c0_i32_1 = arith.constant 0 : i32
    return %arg1, %c0_i32, %c0_i32_0 : i32, i32, i32
  }
  func.func @transform_5(%arg0: i32, %arg1: i32) -> (i32, i32, i32) {
    %c0_i32 = arith.constant 0 : i32
    %c0_i32_0 = arith.constant 0 : i32
    %c0_i32_1 = arith.constant 0 : i32
    return %arg1, %c0_i32, %c0_i32_0 : i32, i32, i32
  }
  func.func @transform_6(%arg0: i32, %arg1: i32) -> (i32, i32, i32) {
    %c0_i32 = arith.constant 0 : i32
    %c0_i32_0 = arith.constant 0 : i32
    %c0_i32_1 = arith.constant 0 : i32
    return %arg1, %c0_i32, %c0_i32_0 : i32, i32, i32
  }
  func.func @transform_7(%arg0: i32, %arg1: i32) -> (i32, i32, i32) {
    %c0_i32 = arith.constant 0 : i32
    %c0_i32_0 = arith.constant 0 : i32
    %c0_i32_1 = arith.constant 0 : i32
    return %arg1, %c0_i32, %c0_i32_0 : i32, i32, i32
  }
  func.func @transform_8(%arg0: i32, %arg1: i32) -> (i32, i32, i32) {
    %c0_i32 = arith.constant 0 : i32
    %c0_i32_0 = arith.constant 0 : i32
    %c0_i32_1 = arith.constant 0 : i32
    return %arg1, %c0_i32, %c0_i32_0 : i32, i32, i32
  }
  func.func @transform_9(%arg0: i32, %arg1: i32) -> (i32, i32, i32) {
    %c0_i32 = arith.constant 0 : i32
    %c0_i32_0 = arith.constant 0 : i32
    %c0_i32_1 = arith.constant 0 : i32
    return %arg1, %c0_i32, %c0_i32_0 : i32, i32, i32
  }
  func.func @transform_10(%arg0: i32, %arg1: i32) -> (i32, i32, i32) {
    %c0_i32 = arith.constant 0 : i32
    %c0_i32_0 = arith.constant 0 : i32
    %c0_i32_1 = arith.constant 0 : i32
    return %arg1, %c0_i32, %c0_i32_0 : i32, i32, i32
  }
  func.func @transform_11(%arg0: i32, %arg1: i32) -> (i32, i32, i32) {
    %c0_i32 = arith.constant 0 : i32
    %c0_i32_0 = arith.constant 0 : i32
    %c0_i32_1 = arith.constant 0 : i32
    return %arg1, %c0_i32, %c0_i32_0 : i32, i32, i32
  }
  func.func @transform_12(%arg0: i32, %arg1: i32) -> (i32, i32, i32) {
    %c0_i32 = arith.constant 0 : i32
    %c0_i32_0 = arith.constant 0 : i32
    %c0_i32_1 = arith.constant 0 : i32
    return %arg1, %c0_i32, %c0_i32_0 : i32, i32, i32
  }
  func.func @transform_13(%arg0: i32, %arg1: i32) -> (i32, i32, i32) {
    %c0_i32 = arith.constant 0 : i32
    %c0_i32_0 = arith.constant 0 : i32
    %c0_i32_1 = arith.constant 0 : i32
    return %arg1, %c0_i32, %c0_i32_0 : i32, i32, i32
  }
  func.func @transform_14(%arg0: i32, %arg1: i32) -> (i32, i32) {
    %c0_i32 = arith.constant 0 : i32
    %c0_i32_0 = arith.constant 0 : i32
    %c0_i32_1 = arith.constant 0 : i32
    return %c0_i32, %c0_i32_0 : i32, i32
  }
  func.func @transform_15(%arg0: i32, %arg1: i32) -> (i32, i32) {
    %c0_i32 = arith.constant 0 : i32
    %c0_i32_0 = arith.constant 0 : i32
    %c0_i32_1 = arith.constant 0 : i32
    return %c0_i32, %c0_i32_0 : i32, i32
  }
  func.func @transform_16(%arg0: i32, %arg1: i32) -> (i32, i32, i32) {
    %c0_i32 = arith.constant 0 : i32
    %c0_i32_0 = arith.constant 0 : i32
    %c0_i32_1 = arith.constant 0 : i32
    return %arg0, %c0_i32, %c0_i32_0 : i32, i32, i32
  }
}

</mosaic_0001>

<bundles_post_ra>
// kernel: forward.1
= control target key start
LH: loop header
LB: loop body
LE: loop exit
PB: predicated region body
PF: predicated region fallthrough
CT: control target
= control target key end

     0   :  { %s2976_s0 = inlined_call_operand.hbm [shape: f32[2,8,32], index: 0, kind: input, shape index: {}]   ;;  %s2977_s1 = inlined_call_operand.vmem [shape: f32[8,32], index: 1, kind: input, shape index: {}]   ;;  %s2978_s2 = inlined_call_operand.vmem [shape: bf16[2,32,96], index: 2, kind: input, shape index: {}]   ;;  %s2979_s3 = inlined_call_operand.vmem [shape: f32[2,1,96], index: 3, kind: input, shape index: {}]   ;;  %s2980_s4 = inlined_call_operand.vmem [shape: bf16[2,32,32], index: 4, kind: input, shape index: {}]   ;;  %s2981_s5 = inlined_call_operand.vmem [shape: f32[2,1,32], index: 5, kind: input, shape index: {}]   ;;  %s2982_s6 = inlined_call_operand.vmem [shape: f32[2,1,32], index: 6, kind: input, shape index: {}]   ;;  %s2983_s7 = inlined_call_operand.vmem [shape: f32[2,1,32], index: 7, kind: input, shape index: {}]   ;;  %s2984_s8 = inlined_call_operand.vmem [shape: bf16[2,32,64], index: 8, kind: input, shape index: {}]   ;;  %s2985_s9 = inlined_call_operand.vmem [shape: f32[2,1,64], index: 9, kind: input, shape index: {}]   ;;  %s2986_s10 = inlined_call_operand.vmem [shape: bf16[2,64,32], index: 10, kind: input, shape index: {}]   ;;  %s2987_s11 = inlined_call_operand.vmem [shape: f32[2,1,32], index: 11, kind: input, shape index: {}]   ;;  %s2988_s12 = inlined_call_operand.hbm [shape: f32[2,1,32], index: 12, kind: input, shape index: {}]   ;;  %s2989_s13 = inlined_call_operand.hbm [shape: f32[2,1,32], index: 13, kind: input, shape index: {}]   ;;  %s2990_s14 = inlined_call_operand.vmem [shape: f32[1,32], index: 14, kind: input, shape index: {}]   ;;  %s2991_s15 = inlined_call_operand.<no memory space> [shape: f32[1,1], index: 15, kind: input, shape index: {}]   ;;  %s2992_s16 = inlined_call_operand.vmem [shape: f32[2,8,1], index: 16, kind: output, shape index: {}]  }
   0x1   :  { %3013 = sst [smem:[#allocation22_spill]] %s2976_s0  ;;  %v21_v0 = vstv %s2991_s15 }
   0x2   :  { %3014 = sst [smem:[#allocation23_spill]] %s2977_s1  ;;  %22 = vst [vmem:[#allocation3] sm:$0x1] %v21_v0 }
   0x3   :  { %3015 = sst [smem:[#allocation24_spill]] %s2978_s2 }
   0x4   :  { %3016 = sst [smem:[#allocation25_spill]] %s2980_s4 }
   0x5   :  { %3017 = sst [smem:[#allocation26_spill]] %s2981_s5 }
   0x6   :  { %3018 = sst [smem:[#allocation27_spill]] %s2982_s6 }
   0x7   :  { %3019 = sst [smem:[#allocation28_spill]] %s2983_s7 }
   0x8   :  { %3020 = sst [smem:[#allocation29_spill]] %s2984_s8 }
   0x9   :  { %3021 = sst [smem:[#allocation30_spill]] %s2985_s9 }
   0xa   :  { %3022 = sst [smem:[#allocation31_spill]] %s2986_s10 }
   0xb   :  { %3023 = sst [smem:[#allocation32_spill]] %s2987_s11 }
   0xc   :  { %3024 = sst [smem:[#allocation33_spill]] %s2988_s12 }
   0xd   :  { %3025 = sst [smem:[#allocation34_spill]] %s2989_s13 }
   0xe   :  { %3026 = sst [smem:[#allocation35_spill]] %s2990_s14 }
   0xf   :  { %3027 = sst [smem:[#allocation36_spill]] %s2992_s16 }
  0x10   :  { %23 = vsyncpa [#allocation5], 0 }
  0x11   :  { %25 = vsyncpa [#allocation5 + $0x1], 0 }
  0x12   :  { %26 = vsyncpa [#allocation7], 0 }
  0x13   :  { %28 = vsyncpa [#allocation7 + $0x1], 0  ;;  %s2462_s23 = smov 0   ;;  %s2464_s24 = smov 0  }
  0x14   :  { %s2466_s25 = smov 0   ;;  %s2468_s26 = smov 0  }
  0x15   :  { %s2470_s27 = smov 0   ;;  %s2472_s28 = smov 0  }
  0x16   :  { %s2474_s29 = smov 0   ;;  %s2476_s15 = smov 0  }
  0x17   :  { %s2478_s30 = smov 0   ;;  %s2480_s0 = smov 0  }
  0x18   :  { %s2482_s17 = smov 0  }
  0x19 LB: > { %3028 = sst [smem:[#allocation11_spill]] %s2322_s24  ;;  %s2994_s18 = sadd.s32 4294967295, %s2358_s17   ;;  %s2358_s17 = sphi %s2482_s17, %s34_s17   ;;  %s2354_s0 = sphi %s2480_s0, %s3093_s0   ;;  %s2350_s30 = sphi %s2478_s30, %s3092_s30   ;;  %s2346_s15 = sphi %s2476_s15, %s3091_s15   ;;  %s2342_s29 = sphi %s2474_s29, %s3090_s29   ;;  %s2338_s28 = sphi %s2472_s28, %s3089_s28   ;;  %s2334_s27 = sphi %s2470_s27, %s3088_s27   ;;  %s2330_s26 = sphi %s2468_s26, %s3087_s26   ;;  %s2326_s25 = sphi %s2466_s25, %s3086_s25   ;;  %s2322_s24 = sphi %s2464_s24, %s3085_s24   ;;  %s2318_s23 = sphi %s2462_s23, %s3084_s23  }
  0x1a   : > { %3029 = sst [smem:[#allocation12_spill]] %s2326_s25  ;;  %s43_s19 = sadd.s32 1, %s2350_s30 }
  0x1b   : > { %3030 = sst [smem:[#allocation13_spill]] %s2334_s27  ;;  %p2517_p0 = scmp.ge.s32.totalorder %s43_s19, 2 }
  0x1c   : > { %3031 = sst [smem:[#allocation14_spill]] %s2338_s28  ;;  %p2999_p1 = scmp.eq.s32.totalorder %s2358_s17, 0 }
  0x1d   : > { %3032 = sst [smem:[#allocation15_spill]] %s2350_s30  ;;  %p2524_p2 = scmp.eq.s32.totalorder %s2994_s18, 0 }
  0x1e   : > { %3033 = sst [smem:[#allocation16_spill]] %s2354_s0  ;;  %s360_s22 = sadd.s32 1, %s2326_s25 }
  0x1f   : > { %3034 = sst [smem:[#allocation17_spill]] %s2358_s17  ;;  %s3095_s19 = smov (%p2517_p0, %s43_s19), 0 }
  0x20   : > { %s3036_s21 = scalar_select %p2524_p2, 1, 0 }
  0x21   : > { %3037 = sst [smem:[#allocation18_spill]] %s3095_s19  ;;  %p367_p3 = scmp.ne.s32.totalorder %s2326_s25, %s2322_s24 }
  0x22   : > { %p373_p4 = scmp.ne.s32.totalorder %s2322_s24, %s2318_s23  ;;  %s357_s14 = ssub.s32 %s2350_s30, %s3095_s19 }
  0x23   : > { %p358_p5 = scmp.eq.s32.totalorder %s357_s14, 0  ;;  %p369_p6 = por %p367_p3, %p2999_p1 }
  0x24   : > { %p2542_p7 = por %p373_p4, %p2524_p2  ;;  %p2998_p8 = scmp.lt.s32.totalorder %s2358_s17, 4 }
  0x25   : > { %s2548_s1 = scalar_select %p358_p5, %s2326_s25, %s360_s22  }
  0x26   : > { %s3038_s18 = scalar_select %p2542_p7, 1, 0 }
  0x27   : > { %3039 = sst [smem:[#allocation19_spill]] %s2548_s1  ;;  %s586_s16 = sand.u32 1, %s2358_s17  }
  0x28   : > { %s2997_s11 = sand.u32 1, %s2326_s25   ;;  %s2996_s10 = sshll.u32 %s2350_s30, 4 }
  0x29   : > { %s589_s9 = scalar_lea.vmem [#allocation6], %s2997_s11  ;;  %s3040_s12 = sld [smem:[#allocation33_spill]] }
  0x2a   : > { %s596_s8 = sshll.u32 %s589_s9, 4  ;;  %p2566_p9 = pnand %p2998_p8, %p369_p6  ;;  %s2562_s8 = int_to_ptr.vmem [resolvable:$true] %s596_s8 }
  0x2b   : > { %s2572_s9 = scalar_lea.sflag [#allocation7], %s586_s16 }
  0x2c   : > { %p3005_p13 = pneg %p2566_p9 }
  0x2f   : > { %s2560_s14 = scalar_lea.hbm %s3040_s12, %s2996_s10  ;;  %s2179_s11 = scalar_lea.hbm %s3040_s12, 32 }
  0x30   : > { %s2174_s19 = scalar_lea.hbm %s2560_s14, 16  ;;  %p2180_p5 = scmp.lt.u32.totalorder %s2560_s14, %s3040_s12 }
  0x31   : > { %p2175_p12 = scmp.ne.s32.totalorder %s2560_s14, %s2174_s19  ;;  %p2181_p6 = scmp.lt.u32.totalorder %s2179_s11, %s2174_s19 }
  0x32   : > { %p2183_p1 = scmp.lt.u32.totalorder %s2174_s19, %s2560_s14 }
  0x33   : > { %p2177_p3 = pnand %p3005_p13, %p2175_p12  ;;  %p2182_p8 = por %p2181_p6, %p2180_p5 }
  0x35   : > { %p2178_p4 = pneg %p2177_p3  ;;  %p2184_p10 = por %p2183_p1, %p2182_p8 }
  0x37   : > { %p2185_p11 = pnand %p2184_p10, %p2178_p4 }
  0x39   : > { %2188 = shalt.err (!%p2185_p11)
}
  0x3a   : > { %s2189_s16 = scalar_lea.vmem %s2562_s8, 16  ;;  %s2360_s10 = smov [#allocation6]  }
  0x3b   : > { %p2190_p12 = scmp.ne.s32.totalorder %s2562_s8, %s2189_s16  ;;  %s2194_s23 = sshll.u32 %s2360_s10, 4  ;;  %s2195_s23 = int_to_ptr.vmem [resolvable:$false] %s2194_s23 }
  0x3c   : > { %s2196_s1 = scalar_lea.vmem %s2195_s23, 32  ;;  %p2197_p2 = scmp.lt.s32.totalorder %s2562_s8, %s2195_s23 }
  0x3d   : > { %p2192_p3 = pnand %p2190_p12, %p3005_p13  ;;  %p2198_p5 = scmp.lt.s32.totalorder %s2196_s1, %s2189_s16 }
  0x3f   : > { %p2193_p7 = pneg %p2192_p3  ;;  %p2199_p6 = por %p2198_p5, %p2197_p2 }
  0x41   : > { %p2200_p1 = pnand %p2199_p6, %p2193_p7 }
  0x43   : > { %2203 = shalt.err (!%p2200_p1)
}
  0x44   : > { %2040 = dma.hbm_to_vmem [thread:$0]  (!%p2566_p9), %s2560_s14, 16, %s2562_s8, %s2572_s9  }
  0x45   : > { %p3042_p2 = scmp.lt.s32.totalorder %s2358_s17, 5  ;;  %p3043_p7 = scmp.ge.s32.totalorder %s2358_s17, 1 }
  0x46   : > { %s46_s11 = sadd.s32 1, %s2354_s0  ;;  %s53_s19 = sadd.s32 1, %s2338_s28 }
  0x47   : > { %p2604_p8 = pnand %p3043_p7, %p3042_p2  ;;  %s3097_s11 = smov (!%p2517_p0, %s46_s11), %s2354_s0 }
  0x48   : > { %p60_p10 = scmp.ne.s32.totalorder %s2338_s28, %s2334_s27  ;;  %p48_p11 = scmp.ge.s32.totalorder %s3097_s11, 2 }
  0x49   : > { %s3044_s7 = scalar_select %p2604_p8, 1, 0 }
  0x4a   : > { %p66_p4 = scmp.ne.s32.totalorder %s2334_s27, %s2330_s26  ;;  %p3045_p12 = scmp.eq.s32.totalorder %s2358_s17, 0 }
  0x4b   : > { %s500_s8 = sand.u32 1, %s2338_s28   ;;  %s3099_s11 = smov (%p48_p11, %s3097_s11), 0 }
  0x4c   : > { %p2619_p3 = por %p3045_p12, %p60_p10  ;;  %3047 = sst [smem:[#allocation20_spill]] %s3099_s11 }
  0x4d   : > { %p3048_p5 = scmp.ne.s32.totalorder %s3036_s21, 0  ;;  %s50_s14 = ssub.s32 %s2354_s0, %s3099_s11 }
  0x4e   : > { %s1859_s10 = sshll.u32 %s500_s8, 3  ;;  %p51_p0 = scmp.eq.s32.totalorder %s50_s14, 0 }
  0x4f   : > { %p2628_p6 = por %p3048_p5, %p66_p4  ;;  %s1860_s26 = sshll.u32 %s2354_s0, 7 }
  0x50   : > { %s504_s23 = scalar_lea.vmem [#allocation4], %s1859_s10  ;;  %s3051_s4 = sld [smem:[#allocation22_spill]] }
  0x51   : > { %s3049_s20 = scalar_select %p2628_p6, 1, 0 }
  0x52   : > { %s511_s1 = sshll.u32 %s504_s23, 4  ;;  %p3052_p1 = scmp.lt.s32.totalorder %s2358_s17, 4  ;;  %s2643_s1 = int_to_ptr.vmem [resolvable:$true] %s511_s1 }
  0x53   : > { %s2636_s12 = scalar_select %p51_p0, %s2338_s28, %s53_s19  }
  0x54   : > { %p2649_p2 = pnand %p3052_p1, %p2619_p3  ;;  %s3054_s14 = sand.u32 1, %s2326_s25  }
  0x55   : > { %3050 = sst [smem:[#allocation21_spill]] %s2636_s12  ;;  %s606_s19 = scalar_lea.vmem [#allocation8], %s3054_s14 }
  0x56   : > { %s2641_s2 = scalar_lea.hbm %s3051_s4, %s1860_s26  ;;  %s613_s10 = sshll.u32 %s606_s19, 4  ;;  %s2662_s10 = int_to_ptr.vmem [resolvable:$true] %s613_s10 }
  0x57   : > { %s3055_s5 = sshll.u32 %s2350_s30, 4  ;;  %s3056_s13 = sld [smem:[#allocation34_spill]] }
  0x58   : > { %s501_s16 = scalar_lea.sflag [#allocation5], %s500_s8  ;;  %s2204_s11 = scalar_lea.hbm %s2641_s2, 128 }
  0x59   : > { %p2205_p7 = scmp.ne.s32.totalorder %s2641_s2, %s2204_s11  ;;  %p2206_p10 = pneg %p2649_p2 }
  0x5a   : > { %s2209_s19 = scalar_lea.hbm %s3051_s4, 256  ;;  %p2210_p12 = scmp.lt.u32.totalorder %s2641_s2, %s3051_s4 }
  0x5b   : > { %p2207_p11 = pnand %p2206_p10, %p2205_p7  ;;  %p2211_p3 = scmp.lt.u32.totalorder %s2209_s19, %s2204_s11 }
  0x5c   : > { %p2213_p0 = scmp.lt.u32.totalorder %s2204_s11, %s2641_s2 }
  0x5d   : > { %s2660_s23 = scalar_lea.hbm %s3056_s13, %s3055_s5  ;;  %p2208_p4 = pneg %p2207_p11 }
  0x5e   : > { %p2212_p5 = por %p2211_p3, %p2210_p12 }
  0x60   : > { %p2214_p1 = por %p2213_p0, %p2212_p5 }
  0x62   : > { %p2215_p13 = pnand %p2214_p1, %p2208_p4 }
  0x64   : > { %2218 = shalt.err (!%p2215_p13)
}
  0x65   : > { %s2219_s8 = scalar_lea.vmem %s2643_s1, 128  ;;  %s2361_s0 = smov [#allocation4]  }
  0x66   : > { %p2220_p7 = scmp.ne.s32.totalorder %s2643_s1, %s2219_s8  ;;  %s2224_s5 = sshll.u32 %s2361_s0, 4  ;;  %s2225_s5 = int_to_ptr.vmem [resolvable:$false] %s2224_s5 }
  0x67   : > { %s2226_s12 = scalar_lea.vmem %s2225_s5, 256  ;;  %p2227_p8 = scmp.lt.s32.totalorder %s2643_s1, %s2225_s5 }
  0x68   : > { %p2222_p11 = pnand %p2220_p7, %p2206_p10  ;;  %p2228_p12 = scmp.lt.s32.totalorder %s2226_s12, %s2219_s8 }
  0x6a   : > { %p2223_p6 = pneg %p2222_p11  ;;  %p2229_p3 = por %p2228_p12, %p2227_p8 }
  0x6c   : > { %p2230_p5 = pnand %p2229_p3, %p2223_p6 }
  0x6e   : > { %2233 = shalt.err (!%p2230_p5)
}
  0x6f   : > { %2037 = dma.hbm_to_vmem [thread:$0]  (!%p2649_p2), %s2641_s2, 128, %s2643_s1, %s501_s16  }
  0x70   : > { %s2234_s30 = scalar_lea.hbm %s2660_s23, 16  ;;  %p3057_p10 = pneg %p2566_p9 }
  0x71   : > { %p2235_p13 = scmp.ne.s32.totalorder %s2660_s23, %s2234_s30  ;;  %s2239_s26 = scalar_lea.hbm %s3056_s13, 32 }
  0x72   : > { %p2240_p8 = scmp.lt.u32.totalorder %s2660_s23, %s3056_s13  ;;  %p2241_p6 = scmp.lt.u32.totalorder %s2239_s26, %s2234_s30 }
  0x73   : > { %p2237_p4 = pnand %p2235_p13, %p3057_p10  ;;  %p2243_p7 = scmp.lt.u32.totalorder %s2234_s30, %s2660_s23 }
  0x74   : > { %p2242_p1 = por %p2241_p6, %p2240_p8 }
  0x75   : > { %p2238_p0 = pneg %p2237_p4 }
  0x76   : > { %p2244_p11 = por %p2243_p7, %p2242_p1 }
  0x78   : > { %p2245_p12 = pnand %p2244_p11, %p2238_p0 }
  0x7a   : > { %2248 = shalt.err (!%p2245_p12)
}
  0x7b   : > { %s2249_s2 = scalar_lea.vmem %s2662_s10, 16  ;;  %p3058_p3 = pmov %p3057_p10 }
  0x7c   : > { %p2250_p2 = scmp.ne.s32.totalorder %s2662_s10, %s2249_s2  ;;  %s2362_s1 = smov [#allocation8]  }
  0x7d   : > { %s2254_s16 = sshll.u32 %s2362_s1, 4  ;;  %s2255_s16 = int_to_ptr.vmem [resolvable:$false] %s2254_s16 }
  0x7e   : > { %p2252_p5 = pnand %p2250_p2, %p3058_p3  ;;  %s2256_s19 = scalar_lea.vmem %s2255_s16, 32 }
  0x7f   : > { %p2257_p10 = scmp.lt.s32.totalorder %s2662_s10, %s2255_s16  ;;  %p2258_p4 = scmp.lt.s32.totalorder %s2256_s19, %s2249_s2 }
  0x80   : > { %p2253_p13 = pneg %p2252_p5 }
  0x81   : > { %p2259_p8 = por %p2258_p4, %p2257_p10 }
  0x83   : > { %p2260_p6 = pnand %p2259_p8, %p2253_p13 }
  0x85   : > { %2263 = shalt.err (!%p2260_p6)
}
  0x86   : > { %2043 = dma.hbm_to_vmem [thread:$0]  (!%p2566_p9), %s2660_s23, 16, %s2662_s10, %s2572_s9  }
  0x87   : > { %p3059_p0 = scmp.ne.s32.totalorder %s3044_s7, 0 }
  0x88   : > { %s624_s8 = sand.u32 (!%p3059_p0), 1, %s2334_s27   ;;  %p3060_p1 = scmp.ne.s32.totalorder (!%p3059_p0), %s3049_s20, 0 }
  0x89   : > { %622 = sbr.rel (%p3059_p0) target bundleno = 2928 (0xb70), region = 84  ;;  %s2716_s0 = sshll.u32 (!%p3059_p0), %s624_s8, 3 }
  0x8a   : > { %s625_s5 = scalar_lea.sflag (!%p3059_p0), [#allocation5], %s624_s8  ;;  %s628_s12 = scalar_lea.vmem (!%p3059_p0), [#allocation4], %s2716_s0 }
  0x90   : > { %2309 = dma.done.wait (%p3060_p1), %s625_s5, 128  }
  0x91   : > { %2311 = vsyncadd (%p3060_p1), %s625_s5, 4294967168  ;;  %s3061_s22 = sadd.s32 4294967295, %s2358_s17   ;;  %s635_s7 = sand.u32 1, %s2322_s24  }
  0x92   : > { %s633_s9 = sand.u32 1, %s3061_s22   ;;  %s2726_s23 = scalar_lea.vmem [#allocation6], %s635_s7 }
  0x93   : > { %s634_s10 = scalar_lea.sflag [#allocation7], %s633_s9  ;;  %p3062_p9 = scmp.ne.s32.totalorder %s3038_s18, 0 }
  0x95   : > { %2313 = dma.done.wait (%p3062_p9), %s634_s10, 32  }
  0x96   : > { %2315 = vsyncadd (%p3062_p9), %s634_s10, 4294967264  ;;  %p738_p7 = scmp.lt.s32.totalorder %s2342_s29, 1  ;;  %p776_p11 = scmp.lt.s32.totalorder %s2346_s15, 1 }
  0x97   : > { %s3063_s21 = sld [smem:[#allocation24_spill]]  ;;  %s3064_s19 = sld [smem:[#allocation25_spill]] }
  0x98   : > { %s2735_s20 = scalar_select %p738_p7, %s2342_s29, 1 }
  0x99   : > { %s3101_s15 = smov (!%p776_p11, %s2346_s15), 1  ;;  %s3066_s13 = sld [smem:[#allocation27_spill]] }
  0x9a   : > { %s1910_s30 = sshll.u32 %s2735_s20, 4  ;;  %s3068_s14 = sld [smem:[#allocation29_spill]] }
  0x9b   : > { %s1913_s17 = sshll.u32 %s2735_s20, 5  ;;  %s3070_s22 = sld [smem:[#allocation31_spill]] }
  0x9c   : > { %s3071_s10 = sld [smem:[#allocation32_spill]]  ;;  %s1873_s18 = sshll.u32 %s3101_s15, 3 }
  0x9d   : > { %s742_s2 = scalar_lea.vmem %s3063_s21, %s1910_s30  ;;  %s2749_s8 = scalar_lea.vmem %s3064_s19, %s1910_s30 }
  0x9e   : > { %s3069_s19 = sld [smem:[#allocation30_spill]]  ;;  %s3072_s25 = sld [smem:[#allocation36_spill]] }
  0x9f   : > { %s756_s28 = scalar_lea.vmem %s3066_s13, %s2735_s20  ;;  %s2787_s26 = scalar_lea.vmem [#allocation8], %s635_s7 }
  0xa0   : > { %s2766_s21 = scalar_lea.vmem %s3068_s14, %s1910_s30  ;;  %p1874_p12 = scmp.ne.s32.totalorder %s2342_s29, 0 }
  0xa1   : > { %s2776_s9 = scalar_lea.vmem %s3070_s22, %s1913_s17  ;;  %v785_v1 = vld [vmem:[%s628_s12] sm:$0xff] (!%p1874_p12)  ;;  %s3073_s17 = sld [smem:[#allocation23_spill]] (!%p1874_p12)  ;;  %vm788_vm0 = vcmask (!%p1874_p12), 261120  }
  0xa2   : > { %s775_s27 = scalar_lea.vmem %s3071_s10, %s2735_s20  ;;  %784 = sbr.rel (%p1874_p12) target bundleno = 171 (0xab), region = 100 }
  0xa4   : > { %s767_s24 = scalar_lea.vmem %s3069_s19, %s2735_s20  ;;  %s2785_s30 = scalar_lea.vmem %s3072_s25, %s1873_s18 }
  0xa7   : > { %v786_v2 = vld [vmem:[%s3073_s17] sm:$0xff] (!%p1874_p12) }
  0xa8   : > { %v787_v3 = vadd.f32 (!%p1874_p12), %v786_v2, %v785_v1 }
  0xaa   : > { %789 = vst.msk [vmem:[#allocation2] sm:$0xff] %vm788_vm0, %v787_v3 }
  0xab PF: > { %v2144_v4 = vld [vmem:[%s742_s2] sm:$0xff]   ;;  %v2363_v5 = vmov 0.0   ;;  %v2145_v6 = vld [vmem:[%s742_s2 + $0x8] sm:$0xff]   ;;  %vm2364_vm1 = vmmov 0   ;;  %vm815_vm2 = vcmask 261120   ;;  %s3074_s7 = scalar_lea.vmem %s2979_s3, %s2735_s20  ;;  %s2365_s6 = smov 104   ;;  %v873_v30 = vlaneseq }
  0xac   : > { %1944 = vmatprep.subr.bf16.mxu0 %v2363_v5  ;;  %1952 = vmatprep.subr.bf16.mxu1 %v2363_v5  ;;  %v1875_v9 = vld [vmem:[%s3074_s7] ss:$0 sm:$0xff]  ;;  %s2366_s2 = smov 120   ;;  %s2367_s16 = smov 112   ;;  %vm882_vm3 = vcmask 64512   ;;  %v2369_v33 = vmov -inf  }
  0xad   : > { %1945 = vmatpush3.bf16.msra.mxu0 %v2144_v4  ;;  %1948 = vmatprep.mubr.msk.bf16.mxu0 %vm2364_vm1, %v2363_v5  ;;  %s2368_s19 = smov 96   ;;  %v874_v31 = vshrl.u32 %v873_v30, 7  ;;  %v876_v32 = vand.u32 127, %v873_v30  ;;  %s2370_s0 = smov 64   ;;  %vm1129_vm5 = vcmask 1043456   ;;  %vm1330_vm6 = vcmask 130048  }
  0xae   : > { %1946 = vmatprep.subr.bf16.mxu0 %v2363_v5  ;;  %1954 = vmatprep.mubr.msk.bf16.mxu1 %vm2364_vm1, %v2363_v5  ;;  %s2371_s5 = smov 8   ;;  %s2372_s22 = smov 16   ;;  %vm1332_vm7 = vcmask 195584   ;;  %vm1540_vm8 = vcmask 523264  }
  0xaf   : > { %vm877_vm4 = vcmp.le.s32.totalorder %v876_v32, %v874_v31  ;;  %s2373_s4 = smov 24   ;;  %s3075_s10 = sld [smem:[#allocation26_spill]] }
  0xb0   : > { %v878_v34 = vsel %vm877_vm4, 0.0, %v2369_v33  ;;  %s3078_s17 = sld [smem:[#allocation28_spill]]  ;;  %p1905_p2 = scmp.ne.s32.totalorder %s2342_s29, 1 }
  0xb1   : > { %v2797_v7 = vld [vmem:[#allocation2] sm:$0xff]  ;;  %1947 = vmatpush3.bf16.msra.mxu0 %v2145_v6  ;;  %vm1638_vm9 = vcmask (!%p1905_p2), 7168  }
  0xb2   : > { %v791_v8 = vpack.c.bf16 %v2797_v7, %v2797_v7  ;;  %1958 = vmatprep.subr.bf16.mxu0 %v2363_v5 }
  0xb4   : > { %1949 = vmatmul.mubr.msk.bf16.vlgmr.msra.gmra.mrb[0].mxu0 %vm815_vm2, %v791_v8 }
  0xb5   : > { %1960 = vmatprep.mubr.msk.bf16.mxu0 %vm2364_vm1, %v2363_v5  ;;  %s3076_s18 = scalar_lea.vmem %s3075_s10, %s2735_s20 }
  0xb6   : > { %s3079_s15 = scalar_lea.vmem %s3078_s17, %s2735_s20 }
 0x187   : > { %v853_v10 = vpop.f32.mrb[0].mxu0 }
 0x188   : > { %v854_v11 = vadd.f32 %v1875_v9, %v853_v10  ;;  %v1950_v12 = vpop.f32.mrb[1].mxu0 }
 0x189   : > { %v856_v13 = vpop.f32.mrb[2].mxu0 }
 0x18a   : > { %866 = vrot.lane.b32.xlu1 %v854_v11, %s2365_s6  ;;  %860 = vrot.lane.b32.xlu0 %v854_v11, %s2366_s2  ;;  %v1951_v14 = vpop.f32.mrb[3].mxu0  ;;  %v2813_v15 = vpack.c.bf16 %v854_v11, %v854_v11 }
 0x18e   : > { %863 = vrot.lane.b32.xlu0 %v854_v11, %s2367_s16  ;;  %880 = vrot.lane.b32.xlu1 %v2813_v15, %s2368_s19 }
 0x1fc   : > { %v867_v16 = vpop.permute.xlu1 %866  ;;  %v861_v17 = vpop.permute.xlu0 %860 }
 0x1fd   : > { %v2816_v18 = vpack.c.bf16 %v861_v17, %v861_v17  ;;  %v2819_v21 = vpack.c.bf16 %v867_v16, %v867_v16 }
 0x1ff   : > { %930 = vrot.lane.b32.xlu0 %v2816_v18, %s2368_s19 }
 0x200   : > { %v864_v19 = vpop.permute.xlu0 %863  ;;  %v881_v20 = vpop.permute.xlu1 %880 }
 0x201   : > { %v2821_v22 = vpack.c.bf16 %v864_v19, %v864_v19  ;;  %v887_v23 = vsel %vm882_vm3, %v881_v20, 0 }
 0x202   : > { %1953 = vmatpush3.bf16.xpose.msra.mxu1 %v887_v23 }
 0x203   : > { %1028 = vrot.lane.b32.xlu0 %v2819_v21, %s2368_s19  ;;  %979 = vrot.lane.b32.xlu1 %v2821_v22, %s2368_s19 }
 0x204   : > { %1964 = vmatprep.subr.bf16.mxu1 %v2363_v5 }
 0x209   : > { %1955 = vmatmul.mubr.msk.bf16.vlgmr.msra.gmra.mrb[0].mxu1 %vm882_vm3, %v2813_v15 }
 0x20a   : > { %1966 = vmatprep.mubr.msk.bf16.mxu1 %vm2364_vm1, %v2363_v5 }
 0x271   : > { %v931_v24 = vpop.permute.xlu0 %930 }
 0x272   : > { %v936_v25 = vsel %vm882_vm3, %v931_v24, 0 }
 0x273   : > { %1959 = vmatpush3.bf16.xpose.msra.mxu0 %v936_v25 }
 0x274   : > { %1970 = vmatprep.subr.bf16.mxu0 %v2363_v5 }
 0x275   : > { %v980_v26 = vpop.permute.xlu1 %979  ;;  %v1029_v28 = vpop.permute.xlu0 %1028 }
 0x276   : > { %v985_v27 = vsel %vm882_vm3, %v980_v26, 0  ;;  %v1034_v29 = vsel %vm882_vm3, %v1029_v28, 0 }
 0x277   : > { %1965 = vmatpush3.bf16.xpose.msra.mxu1 %v985_v27 }
 0x278   : > { %1976 = vmatprep.subr.bf16.mxu1 %v2363_v5 }
 0x27a   : > { %1961 = vmatmul.mubr.msk.bf16.vlgmr.msra.gmra.mrb[4].mxu0 %vm882_vm3, %v2816_v18 }
 0x27b   : > { %1971 = vmatpush3.bf16.xpose.msra.mxu0 %v1034_v29  ;;  %1972 = vmatprep.mubr.msk.bf16.mxu0 %vm2364_vm1, %v2363_v5 }
 0x27c   : > { %1982 = vmatprep.subr.bf16.mxu0 %v2363_v5 }
 0x27e   : > { %1967 = vmatmul.mubr.msk.bf16.vlgmr.msra.gmra.mrb[4].mxu1 %vm882_vm3, %v2821_v22 }
 0x27f   : > { %1978 = vmatprep.mubr.msk.bf16.mxu1 %vm2364_vm1, %v2363_v5 }
 0x282   : > { %1973 = vmatmul.mubr.msk.bf16.vlgmr.msra.gmra.mrb[8].mxu0 %vm882_vm3, %v2819_v21 }
 0x283   : > { %1984 = vmatprep.mubr.msk.bf16.mxu0 %vm2364_vm1, %v2363_v5 }
 0x2dc   : > { %v923_v35 = vpop.f32.mrb[0].mxu1 }
 0x2dd   : > { %v924_v36 = vadd.f32 %v923_v35, %v878_v34  ;;  %v1956_v37 = vpop.f32.mrb[1].mxu1 }
 0x2de   : > { %v926_v38 = vpop.f32.mrb[2].mxu1 }
 0x2df   : > { %v1957_v39 = vpop.f32.mrb[3].mxu1  ;;  %v1076_v40 = vsel %vm882_vm3, %v924_v36, -inf }
 0x2e0   : > { %1077 = vmax.xlane.f32.xlu1 %v1076_v40 }
 0x34d   : > { %v972_v41 = vpop.f32.mrb[4].mxu0 }
 0x34e   : > { %v973_v42 = vadd.f32 %v972_v41, %v878_v34  ;;  %v1962_v43 = vpop.f32.mrb[5].mxu0 }
 0x34f   : > { %v975_v44 = vpop.f32.mrb[6].mxu0 }
 0x350   : > { %v1963_v45 = vpop.f32.mrb[7].mxu0  ;;  %v1079_v46 = vsel %vm882_vm3, %v973_v42, -inf }
 0x351   : > { %v1021_v47 = vpop.f32.mrb[4].mxu1  ;;  %1080 = vmax.xlane.f32.xlu0 %v1079_v46  ;;  %v2146_v45 = vld [vmem:[%s2749_s8] sm:$0xff]   ;;  %v2147_v46 = vld [vmem:[%s2749_s8 + $0x8] sm:$0xff]  }
 0x352   : > { %v1022_v48 = vadd.f32 %v1021_v47, %v878_v34  ;;  %v1968_v49 = vpop.f32.mrb[5].mxu1 }
 0x353   : > { %v1024_v50 = vpop.f32.mrb[6].mxu1 }
 0x354   : > { %v1969_v51 = vpop.f32.mrb[7].mxu1  ;;  %v1082_v52 = vsel %vm882_vm3, %v1022_v48, -inf }
 0x355   : > { %1083 = vmax.xlane.f32.xlu0 %v1082_v52  ;;  %v1070_v53 = vpop.f32.mrb[8].mxu0 }
 0x356   : > { %v1071_v54 = vadd.f32 %v1070_v53, %v878_v34  ;;  %v1974_v55 = vpop.f32.mrb[9].mxu0 }
 0x357   : > { %v1073_v56 = vpop.f32.mrb[10].mxu0 }
 0x358   : > { %v1975_v57 = vpop.f32.mrb[11].mxu0  ;;  %v1085_v58 = vsel %vm882_vm3, %v1071_v54, -inf }
 0x359   : > { %1086 = vmax.xlane.f32.xlu1 %v1085_v58 }
 0x36a   : > { %1173 = vrot.lane.b32.xlu1 %v2816_v18, %s2370_s0 }
 0x36b   : > { %1124 = vrot.lane.b32.xlu0 %v2813_v15, %s2370_s0 }
 0x36d   : > { %v1078_v59 = vpop.xlane.xlu1 %1077 }
 0x36e   : > { %v1088_v60 = vsub.f32 %v924_v36, %v1078_v59 }
 0x370   : > { %v1092_v61 = vmul.f32 1.442695, %v1088_v60 }
 0x372   : > { %2154 = vpow2.f32 %v1092_v61 }
 0x37c   : > { %v2155_v62 = vpop.eup %2154 }
 0x37d   : > { %v1100_v63 = vsel %vm882_vm3, %v2155_v62, 0.0 }
 0x38a   : > { %1101 = vadd.xlane.f32.xlu0 %v1100_v63 }
 0x3de   : > { %v1081_v0 = vpop.xlane.xlu0 %1080 }
 0x3df   : > { %v1089_v1 = vsub.f32 %v973_v42, %v1081_v0 }
 0x3e1   : > { %v1094_v2 = vmul.f32 1.442695, %v1089_v1 }
 0x3e2   : > { %v1084_v3 = vpop.xlane.xlu0 %1083 }
 0x3e3   : > { %2156 = vpow2.f32 %v1094_v2  ;;  %v1090_v4 = vsub.f32 %v1022_v48, %v1084_v3  ;;  %v1887_v2 = vld [vmem:[%s3076_s18] ss:$0 sm:$0xff] }
 0x3e5   : > { %v1096_v6 = vmul.f32 1.442695, %v1090_v4 }
 0x3e6   : > { %v1125_v8 = vpop.permute.xlu0 %1124  ;;  %v1087_v9 = vpop.xlane.xlu1 %1086 }
 0x3e7   : > { %2158 = vpow2.f32 %v1096_v6  ;;  %v1131_v10 = vsel %vm1129_vm5, %v1125_v8, 0  ;;  %v1091_v11 = vsub.f32 %v1071_v54, %v1087_v9 }
 0x3e8   : > { %1977 = vmatpush3.bf16.msra.mxu1 %v1131_v10 }
 0x3e9   : > { %v1098_v12 = vmul.f32 1.442695, %v1091_v11  ;;  %1988 = vmatprep.subr.bf16.mxu1 %v2363_v5 }
 0x3ea   : > { %v1174_v13 = vpop.permute.xlu1 %1173 }
 0x3eb   : > { %2160 = vpow2.f32 %v1098_v12  ;;  %v1179_v14 = vsel %vm1129_vm5, %v1174_v13, 0 }
 0x3ec   : > { %1983 = vmatpush3.bf16.msra.mxu0 %v1179_v14 }
 0x3ed   : > { %v2157_v15 = vpop.eup %2156  ;;  %1994 = vmatprep.subr.bf16.mxu0 %v2363_v5 }
 0x3ee   : > { %v1103_v16 = vsel %vm882_vm3, %v2157_v15, 0.0 }
 0x3ef   : > { %1104 = vadd.xlane.f32.xlu1 %v1103_v16 }
 0x3f1   : > { %v2159_v17 = vpop.eup %2158 }
 0x3f2   : > { %v1106_v18 = vsel %vm882_vm3, %v2159_v17, 0.0 }
 0x3f3   : > { %1107 = vadd.xlane.f32.xlu0 %v1106_v18  ;;  %v2149_v18 = vld [vmem:[%s2766_s21 + $0x8] sm:$0xff]  }
 0x3f5   : > { %v2161_v19 = vpop.eup %2160 }
 0x3f6   : > { %v1109_v20 = vsel %vm882_vm3, %v2161_v19, 0.0 }
 0x3f7   : > { %1110 = vadd.xlane.f32.xlu1 %v1109_v20 }
 0x408   : > { %1221 = vrot.lane.b32.xlu1 %v2821_v22, %s2370_s0 }
 0x409   : > { %1269 = vrot.lane.b32.xlu0 %v2819_v21, %s2370_s0 }
 0x417   : > { %v1102_v23 = vpop.xlane.xlu0 %1101 }
 0x418   : > { %2162 = vrcp.f32 %v1102_v23 }
 0x422   : > { %v2163_v24 = vpop.eup %2162 }
 0x423   : > { %v1116_v25 = vmul.f32 %v2163_v24, %v2155_v62 }
 0x425   : > { %v1120_v26 = vpack.c.bf16 %v1116_v25, %v1116_v25 }
 0x427   : > { %1979 = vmatmul.mubr.msk.bf16.vlgmr.msra.gmra.mrb[8].mxu1 %vm882_vm3, %v1120_v26  ;;  %v1891_v26 = vld [vmem:[%s756_s28] ss:$0 sm:$0xff] }
 0x428   : > { %1990 = vmatprep.mubr.msk.bf16.mxu1 %vm2364_vm1, %v2363_v5 }
 0x47c   : > { %v1105_v27 = vpop.xlane.xlu1 %1104 }
 0x47d   : > { %2164 = vrcp.f32 %v1105_v27 }
 0x480   : > { %v1108_v28 = vpop.xlane.xlu0 %1107 }
 0x481   : > { %2166 = vrcp.f32 %v1108_v28  ;;  %v1892_v28 = vld [vmem:[%s3079_s15] ss:$0 sm:$0xff] }
 0x484   : > { %v1111_v29 = vpop.xlane.xlu1 %1110  ;;  %v1270_v21 = vpop.permute.xlu0 %1269 }
 0x485   : > { %2168 = vrcp.f32 %v1111_v29  ;;  %v1275_v36 = vsel %vm1129_vm5, %v1270_v21, 0  ;;  %v2153_v21 = vld [vmem:[%s2776_s9 + $0x18] sm:$0xff]  }
 0x487   : > { %v2165_v22 = vpop.eup %2164 }
 0x488   : > { %v1117_v30 = vmul.f32 %v2165_v22, %v2157_v15  ;;  %v1222_v31 = vpop.permute.xlu1 %1221 }
 0x489   : > { %v1227_v32 = vsel %vm1129_vm5, %v1222_v31, 0  ;;  %v2152_v31 = vld [vmem:[%s2776_s9 + $0x10] sm:$0xff]  }
 0x48a   : > { %1989 = vmatpush3.bf16.msra.mxu1 %v1227_v32  ;;  %v1121_v33 = vpack.c.bf16 %v1117_v30, %v1117_v30  ;;  %v1893_v32 = vld [vmem:[%s767_s24] ss:$0 sm:$0xff] }
 0x48b   : > { %v2167_v34 = vpop.eup %2166  ;;  %2000 = vmatprep.subr.bf16.mxu1 %v2363_v5 }
 0x48c   : > { %v1118_v35 = vmul.f32 %v2167_v34, %v2159_v17  ;;  %1985 = vmatmul.mubr.msk.bf16.vlgmr.msra.gmra.mrb[12].mxu0 %vm882_vm3, %v1121_v33  ;;  %v2148_v17 = vld [vmem:[%s2766_s21] sm:$0xff]  }
 0x48d   : > { %1995 = vmatpush3.bf16.msra.mxu0 %v1275_v36  ;;  %1996 = vmatprep.mubr.msk.bf16.mxu0 %vm2364_vm1, %v2363_v5 }
 0x48e   : > { %v1122_v37 = vpack.c.bf16 %v1118_v35, %v1118_v35  ;;  %2008 = vmatprep.subr.bf16.mxu0 %v2363_v5 }
 0x48f   : > { %v2169_v38 = vpop.eup %2168 }
 0x490   : > { %v1119_v39 = vmul.f32 %v2169_v38, %v2161_v19  ;;  %1991 = vmatmul.mubr.msk.bf16.vlgmr.msra.gmra.mrb[12].mxu1 %vm882_vm3, %v1122_v37  ;;  %v2151_v19 = vld [vmem:[%s2776_s9 + $0x8] sm:$0xff]  }
 0x491   : > { %2004 = vmatprep.mubr.msk.bf16.mxu1 %vm2364_vm1, %v2363_v5  ;;  %2001 = vmatpush3.bf16.msra.mxu1 %v2146_v45 }
 0x492   : > { %v1123_v40 = vpack.c.bf16 %v1119_v39, %v1119_v39  ;;  %2002 = vmatprep.subr.bf16.mxu1 %v2363_v5 }
 0x494   : > { %1997 = vmatmul.mubr.msk.bf16.vlgmr.msra.gmra.mrb[16].mxu0 %vm882_vm3, %v1123_v40 }
 0x495   : > { %2012 = vmatprep.mubr.msk.bf16.mxu0 %vm2364_vm1, %v2363_v5  ;;  %2003 = vmatpush3.bf16.msra.mxu1 %v2147_v46 }
 0x496   : > { %2016 = vmatprep.subr.bf16.mxu1 %v2363_v5  ;;  %2009 = vmatpush3.bf16.msra.mxu0 %v2148_v17 }
 0x497   : > { %2010 = vmatprep.subr.bf16.mxu0 %v2363_v5 }
 0x49a   : > { %2011 = vmatpush3.bf16.msra.mxu0 %v2149_v18 }
 0x4fa   : > { %v1167_v41 = vpop.f32.mrb[8].mxu1 }
 0x4fb   : > { %v1980_v42 = vpop.f32.mrb[9].mxu1 }
 0x4fc   : > { %v1170_v43 = vpop.f32.mrb[10].mxu1 }
 0x4fd   : > { %v1981_v44 = vpop.f32.mrb[11].mxu1 }
 0x55f   : > { %v1215_v47 = vpop.f32.mrb[12].mxu0 }
 0x560   : > { %1318 = vrot.lane.b32.xlu1 %v1215_v47, %s2371_s5  ;;  %v1986_v48 = vpop.f32.mrb[13].mxu0 }
 0x561   : > { %v1218_v49 = vpop.f32.mrb[14].mxu0 }
 0x562   : > { %v1987_v50 = vpop.f32.mrb[15].mxu0 }
 0x563   : > { %v1263_v51 = vpop.f32.mrb[12].mxu1 }
 0x564   : > { %1322 = vrot.lane.b32.xlu0 %v1263_v51, %s2372_s22  ;;  %v1992_v52 = vpop.f32.mrb[13].mxu1 }
 0x565   : > { %v1266_v53 = vpop.f32.mrb[14].mxu1 }
 0x566   : > { %v1993_v54 = vpop.f32.mrb[15].mxu1 }
 0x567   : > { %v1311_v55 = vpop.f32.mrb[16].mxu0 }
 0x568   : > { %1326 = vrot.lane.b32.xlu1 %v1311_v55, %s2373_s4  ;;  %v1998_v56 = vpop.f32.mrb[17].mxu0 }
 0x569   : > { %v1314_v57 = vpop.f32.mrb[18].mxu0  ;;  %v1903_v56 = vld [vmem:[%s2726_s23] ss:$0 sm:$0xff] }
 0x56a   : > { %v1999_v58 = vpop.f32.mrb[19].mxu0 }
 0x56b   : > { %v1904_v58 = vld [vmem:[%s2787_s26] ss:$0 sm:$0xff] }
 0x5d2   : > { %v1319_v59 = vpop.permute.xlu1 %1318 }
 0x5d3   : > { %v1329_v61 = vsel %vm882_vm3, %v1167_v41, %v1319_v59 }
 0x5d6   : > { %v1323_v60 = vpop.permute.xlu0 %1322 }
 0x5d7   : > { %v1331_v62 = vsel %vm1330_vm6, %v1329_v61, %v1323_v60 }
 0x5da   : > { %v1327_v63 = vpop.permute.xlu1 %1326 }
 0x5db   : > { %v1333_v0 = vsel %vm1332_vm7, %v1331_v62, %v1327_v63 }
 0x5dc   : > { %v1334_v1 = vpack.c.bf16 %v1333_v0, %v1333_v0  ;;  %v1907_v0 = vld [vmem:[#allocation3] ss:$0 sm:$0xff] (!%p1905_p2) }
 0x5de   : > { %2005 = vmatmul.mubr.msk.bf16.vlgmr.msra.gmra.mrb[16].mxu1 %vm815_vm2, %v1334_v1 }
 0x5df   : > { %2024 = vmatprep.mubr.msk.bf16.mxu1 %vm2364_vm1, %v2363_v5 }
 0x6b1   : > { %v1395_v3 = vpop.f32.mrb[16].mxu1 }
 0x6b2   : > { %v1396_v4 = vadd.f32 %v1887_v2, %v1395_v3  ;;  %v2006_v6 = vpop.f32.mrb[17].mxu1 }
 0x6b3   : > { %v1398_v8 = vpop.f32.mrb[18].mxu1 }
 0x6b4   : > { %v2007_v9 = vpop.f32.mrb[19].mxu1  ;;  %v1401_v10 = vadd.f32 %v1396_v4, %v2797_v7  ;;  %v2150_v7 = vld [vmem:[%s2776_s9] sm:$0xff]   ;;  %s3082_s9 = sld [smem:[#allocation35_spill]] (!%p1905_p2) }
 0x6b5   : > { %2017 = vmatpush3.bf16.msra.mxu1 %v2150_v7 }
 0x6b6   : > { %v1402_v11 = vsel %vm815_vm2, %v1401_v10, 0.0  ;;  %2018 = vmatprep.subr.bf16.mxu1 %v2363_v5 }
 0x6b7   : > { %1403 = vadd.xlane.f32.xlu0 %v1402_v11 }
 0x6b9   : > { %2019 = vmatpush3.bf16.msra.mxu1 %v2151_v19 }
 0x6ba   : > { %2020 = vmatprep.subr.bf16.mxu1 %v2363_v5  ;;  %v1906_v61 = vld [vmem:[%s3082_s9] ss:$0 sm:$0xff] (!%p1905_p2) }
 0x6bd   : > { %2021 = vmatpush3.bf16.msra.mxu1 %v2152_v31 }
 0x6be   : > { %2022 = vmatprep.subr.bf16.mxu1 %v2363_v5  ;;  %v1897_v5 = vld [vmem:[%s775_s27] ss:$0 sm:$0xff] }
 0x6c1   : > { %2023 = vmatpush3.bf16.msra.mxu1 %v2153_v21 }
 0x744   : > { %v1404_v12 = vpop.xlane.xlu0 %1403 }
 0x745   : > { %v1406_v13 = vmul.f32 0.03125, %v1404_v12 }
 0x747   : > { %v1407_v14 = vsub.f32 %v1401_v10, %v1406_v13 }
 0x749   : > { %v1408_v15 = vmul.f32 %v1407_v14, %v1407_v14 }
 0x74b   : > { %v1409_v16 = vsel %vm815_vm2, %v1408_v15, 0.0 }
 0x74c   : > { %1410 = vadd.xlane.f32.xlu1 %v1409_v16 }
 0x7d9   : > { %v1411_v20 = vpop.xlane.xlu1 %1410 }
 0x7da   : > { %v1412_v23 = vmul.f32 0.03125, %v1411_v20 }
 0x7dc   : > { %v1413_v24 = vadd.f32 1e-05, %v1412_v23 }
 0x7de   : > { %2170 = vrsqrt.f32 %v1413_v24 }
 0x7e8   : > { %v2171_v25 = vpop.eup %2170 }
 0x7e9   : > { %v1415_v27 = vmul.f32 %v2171_v25, %v1407_v14 }
 0x7eb   : > { %v1423_v29 = vmul.f32 %v1891_v26, %v1415_v27 }
 0x7ed   : > { %v1431_v22 = vadd.f32 %v1892_v28, %v1423_v29 }
 0x7ef   : > { %v1432_v30 = vpack.c.bf16 %v1431_v22, %v1431_v22 }
 0x7f1   : > { %2013 = vmatmul.mubr.msk.bf16.vlgmr.msra.gmra.mrb[20].mxu0 %vm815_vm2, %v1432_v30 }
 0x8c4   : > { %v1493_v33 = vpop.f32.mrb[20].mxu0 }
 0x8c5   : > { %v1494_v34 = vadd.f32 %v1893_v32, %v1493_v33  ;;  %v2014_v35 = vpop.f32.mrb[21].mxu0 }
 0x8c6   : > { %v1496_v36 = vpop.f32.mrb[22].mxu0 }
 0x8c7   : > { %v1499_v37 = vmax.f32 %v1494_v34, 0.0  ;;  %v2015_v38 = vpop.f32.mrb[23].mxu0 }
 0x8c9   : > { %v1500_v39 = vpack.c.bf16 %v1499_v37, %v1499_v37 }
 0x8cb   : > { %2025 = vmatmul.mubr.msk.bf16.vlgmr.msra.gmra.mrb[20].mxu1 %vm1540_vm8, %v1500_v39 }
 0x99e   : > { %v1578_v40 = vpop.f32.mrb[20].mxu1 }
 0x99f   : > { %v1579_v41 = vadd.f32 %v1897_v5, %v1578_v40  ;;  %v2026_v42 = vpop.f32.mrb[21].mxu1 }
 0x9a0   : > { %v1581_v43 = vpop.f32.mrb[22].mxu1 }
 0x9a1   : > { %v2027_v44 = vpop.f32.mrb[23].mxu1  ;;  %v1584_v45 = vadd.f32 %v1579_v41, %v1431_v22 }
 0x9a3   : > { %v1585_v46 = vsel %vm815_vm2, %v1584_v45, 0.0 }
 0x9a4   : > { %1586 = vadd.xlane.f32.xlu0 %v1585_v46 }
 0xa31   : > { %v1587_v47 = vpop.xlane.xlu0 %1586 }
 0xa32   : > { %v1588_v48 = vmul.f32 0.03125, %v1587_v47 }
 0xa34   : > { %v1589_v49 = vsub.f32 %v1584_v45, %v1588_v48 }
 0xa36   : > { %v1590_v50 = vmul.f32 %v1589_v49, %v1589_v49 }
 0xa38   : > { %v1591_v51 = vsel %vm815_vm2, %v1590_v50, 0.0 }
 0xa39   : > { %1592 = vadd.xlane.f32.xlu0 %v1591_v51 }
 0xac6   : > { %v1593_v52 = vpop.xlane.xlu0 %1592 }
 0xac7   : > { %v1594_v53 = vmul.f32 0.03125, %v1593_v52 }
 0xac9   : > { %v1595_v54 = vadd.f32 1e-05, %v1594_v53 }
 0xacb   : > { %2172 = vrsqrt.f32 %v1595_v54 }
 0xad5   : > { %v2173_v55 = vpop.eup %2172 }
 0xad6   : > { %v1597_v57 = vmul.f32 %v2173_v55, %v1589_v49  ;;  %1618 = sbr.rel (%p1905_p2) target bundleno = 2928 (0xb70), region = 104 }
 0xad8   : > { %v1605_v59 = vmul.f32 %v1903_v56, %v1597_v57 }
 0xada   : > { %v1613_v60 = vadd.f32 %v1904_v58, %v1605_v59 }
 0xadc   : > { %1614 = vst.msk [vmem:[#allocation2] sm:$0xff] %vm815_vm2, %v1613_v60  ;;  %v1626_v62 = vmul.f32 (!%p1905_p2), %v1906_v61, %v1613_v60 }
 0xade   : > { %v1627_v63 = vsel %vm815_vm2, %v1626_v62, 0.0 }
 0xadf   : > { %1628 = vadd.xlane.f32.xlu0 %v1627_v63 }
 0xb6c   : > { %v1629_v1 = vpop.xlane.xlu0 %1628 }
 0xb6d   : > { %v1637_v2 = vadd.f32 %v1907_v0, %v1629_v1 }
 0xb6f   : > { %1639 = vst.msk [vmem:[%s2785_s30] sm:$0xff] %vm1638_vm9, %v1637_v2 }
 0xb70 PF: > { %s3083_s23 = sld [smem:[#allocation17_spill]]  ;;  %s3085_s24 = sld [smem:[#allocation12_spill]] }
 0xb71   : > { %s3086_s25 = sld [smem:[#allocation19_spill]]  ;;  %s3087_s26 = sld [smem:[#allocation13_spill]] }
 0xb72   : > { %s3088_s27 = sld [smem:[#allocation14_spill]]  ;;  %s3089_s28 = sld [smem:[#allocation21_spill]] }
 0xb73   : > { %s3090_s29 = sld [smem:[#allocation15_spill]]  ;;  %s3091_s15 = sld [smem:[#allocation16_spill]] }
 0xb74   : > { %s3092_s30 = sld [smem:[#allocation18_spill]]  ;;  %s3093_s0 = sld [smem:[#allocation20_spill]] }
 0xb76   : > { %s34_s17 = sadd.s32 1, %s3083_s23   ;;  %s3084_s23 = sld [smem:[#allocation11_spill]] }
 0xb77   : > { %p31_p3 = scmp.ge.s32.totalorder %s34_s17, 6  }
 0xb79   :  { %33 = sbr.rel (!%p31_p3) target bundleno = 25 (0x19), region = 186 }
 0xb80   :  { %1659 = vsyncpa [#allocation5], 1 }
 0xb81   :  { %1661 = vsyncpa [#allocation5 + $0x1], 1 }
 0xb82   :  { %1662 = vsyncpa [#allocation7], 1 }
 0xb83   :  { %1664 = vsyncpa [#allocation7 + $0x1], 1 }

</bundles_post_ra>
